<compile_context>
chip_gen: v5e
topology: v5e:2x2
jax: 0.10.0
libtpu: 0.0.40
codegen_flags: <defaults>
</compile_context>

<pallas_src>
import functools

import jax
import jax.numpy as jnp
from jax.experimental import pallas as pl
from jax.experimental.pallas import tpu as pltpu

BN_EPS = 1e-3


def _colsum_stats(x):
    """Per-channel (sublane-row) sum and sum-of-squares -> (C, 2)."""
    s = jnp.sum(x, axis=-1, keepdims=True)
    ss = jnp.sum(x * x, axis=-1, keepdims=True)
    return jnp.concatenate([s, ss], axis=-1)


# ---------------------------------------------------------------------------
# Kernel 1: streaming fusion-BN statistics (fused map is recomputed, not stored)
# ---------------------------------------------------------------------------
def _fusion_stats_kernel(f1_ref, f2_ref, wft_ref, wfb_ref, fstats_ref):
    @pl.when(pl.program_id(1) == 0)
    def _init():
        fstats_ref[...] = jnp.zeros_like(fstats_ref)

    fused = (jnp.dot(wft_ref[...], f1_ref[...], preferred_element_type=jnp.float32)
             + jnp.dot(wfb_ref[...], f2_ref[...], preferred_element_type=jnp.float32))
    fstats_ref[...] += _colsum_stats(fused)


# ---------------------------------------------------------------------------
# Kernel 2: per-batch hoisted fused/K/V slabs + attention + head convs + stats
# ---------------------------------------------------------------------------
def _attention_kernel(f1_ref, f2_ref, wft_ref, wfb_ref,
                      wq_ref, bq_ref, wk_ref, wv_ref,
                      w1t_ref, w1b_ref, c1_ref,
                      w2t_ref, w2b_ref, c2_ref,
                      o1_ref, o2_ref, s1_ref, s2_ref,
                      fused_ref, kt_ref, v_ref, *, tq):
    qi = pl.program_id(1)

    @pl.when(qi == 0)
    def _per_batch():
        s1_ref[...] = jnp.zeros_like(s1_ref)
        s2_ref[...] = jnp.zeros_like(s2_ref)
        # Recompute the (pre-BN) fused map once per batch; BN itself is folded
        # into wq/wk/wv in the wrapper, so no normalize pass is needed here.
        fused = (jnp.dot(wft_ref[...], f1_ref[...], preferred_element_type=jnp.float32)
                 + jnp.dot(wfb_ref[...], f2_ref[...], preferred_element_type=jnp.float32))
        fused_ref[...] = fused
        k = jnp.dot(wk_ref[...], fused, preferred_element_type=jnp.float32)
        kt_ref[...] = k.T.astype(jnp.bfloat16)          # (S, C) once per batch
        v_ref[...] = jnp.dot(wv_ref[...], fused,
                             preferred_element_type=jnp.float32).astype(jnp.bfloat16)

    start = qi * tq
    if tq % 128 == 0:
        start = pl.multiple_of(start, 128)
    f1_t = f1_ref[:, pl.ds(start, tq)]                  # (C, Tq)
    f2_t = f2_ref[:, pl.ds(start, tq)]                  # (C, Tq)
    fused_q = fused_ref[:, pl.ds(start, tq)]            # (C, Tq)

    # q includes softmax scale and the folded BN mean/rstd (wrapper-side).
    q = (jnp.dot(wq_ref[...], fused_q, preferred_element_type=jnp.float32)
         + bq_ref[...]).astype(jnp.bfloat16)            # (C, Tq)

    # Key-major scores: no per-tile transposes anywhere.
    scores = jnp.dot(kt_ref[...], q, preferred_element_type=jnp.float32)   # (S, Tq)
    m = jnp.max(scores, axis=0, keepdims=True)                             # (1, Tq)
    e = jnp.exp(scores - m)                                                # (S, Tq)
    denom = jnp.sum(e, axis=0, keepdims=True)                              # (1, Tq)

    # Deferred softmax normalization: scale the small (C, Tq) result instead
    # of dividing the (S, Tq) block; reciprocal runs on the EUP slot.
    sa0 = jnp.dot(v_ref[...], e.astype(jnp.bfloat16),
                  preferred_element_type=jnp.float32)                      # (C, Tq)
    sa = sa0 * pl.reciprocal(denom, approx=True)

    # Head convs; the SA projection (wp, bp) and the V bias are folded into
    # w1b/w2b and c1/c2 in the wrapper.
    o1 = (jnp.dot(w1t_ref[...], f1_t, preferred_element_type=jnp.float32)
          + jnp.dot(w1b_ref[...], sa, preferred_element_type=jnp.float32)
          + c1_ref[...])
    o2 = (jnp.dot(w2t_ref[...], f2_t, preferred_element_type=jnp.float32)
          + jnp.dot(w2b_ref[...], sa, preferred_element_type=jnp.float32)
          + c2_ref[...])

    o1_ref[...] = o1
    o2_ref[...] = o2
    s1_ref[...] += _colsum_stats(o1)
    s2_ref[...] += _colsum_stats(o2)


# ---------------------------------------------------------------------------
# Kernel 3: bn1 / bn2 affine (precomputed scale/shift) + ReLU
# ---------------------------------------------------------------------------
def _bn_relu_kernel(o1_ref, o2_ref, a1_ref, b1_ref, a2_ref, b2_ref,
                    out1_ref, out2_ref):
    out1_ref[...] = jnp.maximum(o1_ref[...] * a1_ref[...] + b1_ref[...], 0.0)
    out2_ref[...] = jnp.maximum(o2_ref[...] * a2_ref[...] + b2_ref[...], 0.0)


# ---------------------------------------------------------------------------
# Wrapper
# ---------------------------------------------------------------------------
def _divisor_tile(s, cap):
    """Largest multiple-of-128 divisor of s that is <= cap; falls back to s."""
    best = None
    t = 128
    while t <= min(cap, s):
        if s % t == 0:
            best = t
        t += 128
    return best if best is not None else s


def _bn_affine(stats_tot, count, eps):
    """stats (C, 2) -> (mean, rsqrt(var + eps)), both (C, 1); one-pass variance."""
    mean = stats_tot[:, 0:1] / count
    var = jnp.maximum(stats_tot[:, 1:2] / count - mean * mean, 0.0)
    return mean, jax.lax.rsqrt(var + eps)


def attention_search(feature1, feature2, params):
    """feature1, feature2: (N, C, H, W) float32 -> (out1, out2), same shape."""
    n, c, h, w = feature1.shape
    s = h * w
    f1 = feature1.reshape(n, c, s)
    f2 = feature2.reshape(n, c, s)

    wf, w1, w2 = params["wf"], params["w1"], params["w2"]
    wq, wk, wv = params["wq"], params["wk"], params["wv"]
    wp, bp = params["wp"], params["bp"]
    wft, wfb = wf[:, :c], wf[:, c:]     # fusion_conv split: [feature1 | feature2]
    w1t, w1b = w1[:, :c], w1[:, c:]     # conv1 split:       [feature1 | SA out]
    w2t, w2b = w2[:, :c], w2[:, c:]     # conv2 split:       [feature2 | SA out]
    bp_col = bp.reshape(c, 1)

    count = float(n * s)                # BatchNorm normalizes over N*H*W
    scale = float(c) ** -0.5            # head_dim ** -0.5 with num_heads=1

    ts = s if s <= 1024 else _divisor_tile(s, 8192)                       # K1/K3
    tq = s if s <= 512 else _divisor_tile(s, max(128, (8 << 20) // (s * 12)))

    def tile_blk(t):
        return pl.BlockSpec((None, c, t), lambda b, i: (b, 0, i))

    full_blk = pl.BlockSpec((None, c, s), lambda b, i: (b, 0, 0))
    wgt_blk = pl.BlockSpec((c, c), lambda b, i: (0, 0))
    col_blk = pl.BlockSpec((c, 1), lambda b, i: (0, 0))
    stat_blk = pl.BlockSpec((None, c, 2), lambda b, i: (b, 0, 0))

    # --- K1: fusion-BN statistics (per batch; summed over batch in XLA) ------
    fstats = pl.pallas_call(
        _fusion_stats_kernel,
        grid=(n, s // ts),
        in_specs=[tile_blk(ts), tile_blk(ts), wgt_blk, wgt_blk],
        out_specs=stat_blk,
        out_shape=jax.ShapeDtypeStruct((n, c, 2), jnp.float32),
        compiler_params=pltpu.CompilerParams(
            dimension_semantics=("parallel", "arbitrary")),
    )(f1, f2, wft, wfb)

    # Fold fusion-BN (mean, rstd), the softmax scale, the SA projection and all
    # foldable biases into tiny per-channel weights (wrapper-side XLA ops).
    fmean, frstd = _bn_affine(jnp.sum(fstats, axis=0), count, BN_EPS)
    wq_eff = wq * frstd.T * scale
    bq = -(wq_eff @ fmean)
    wk_eff = wk * frstd.T               # K bias is softmax-shift-invariant: dropped
    wv_eff = wv * frstd.T
    bv = -(wv_eff @ fmean)
    w1b_eff = w1b @ wp
    w2b_eff = w2b @ wp
    c1 = w1b @ (wp @ bv + bp_col)
    c2 = w2b @ (wp @ bv + bp_col)

    # --- K2: attention + head convs + bn1/bn2 statistics ---------------------
    attn_kernel = functools.partial(_attention_kernel, tq=tq)
    o1_raw, o2_raw, s1, s2 = pl.pallas_call(
        attn_kernel,
        grid=(n, s // tq),
        in_specs=[full_blk, full_blk,          # f1 / f2 full slabs (per batch)
                  wgt_blk, wgt_blk,            # fusion split weights
                  wgt_blk, col_blk,            # wq_eff, bq
                  wgt_blk, wgt_blk,            # wk_eff, wv_eff
                  wgt_blk, wgt_blk, col_blk,   # w1t, w1b_eff, c1
                  wgt_blk, wgt_blk, col_blk],  # w2t, w2b_eff, c2
        out_specs=[tile_blk(tq), tile_blk(tq), stat_blk, stat_blk],
        out_shape=[
            jax.ShapeDtypeStruct((n, c, s), jnp.float32),
            jax.ShapeDtypeStruct((n, c, s), jnp.float32),
            jax.ShapeDtypeStruct((n, c, 2), jnp.float32),
            jax.ShapeDtypeStruct((n, c, 2), jnp.float32),
        ],
        scratch_shapes=[
            pltpu.VMEM((c, s), jnp.float32),   # fused (pre-BN) slab, per batch
            pltpu.VMEM((s, c), jnp.bfloat16),  # K^T slab, per batch
            pltpu.VMEM((c, s), jnp.bfloat16),  # V slab, per batch
        ],
        compiler_params=pltpu.CompilerParams(
            dimension_semantics=("parallel", "arbitrary"),
            vmem_limit_bytes=48 << 20),
    )(f1, f2, wft, wfb, wq_eff, bq, wk_eff, wv_eff,
      w1t, w1b_eff, c1, w2t, w2b_eff, c2)

    # --- K3: bn1/bn2 normalize (affine precomputed) + ReLU -------------------
    m1, r1 = _bn_affine(jnp.sum(s1, axis=0), count, BN_EPS)
    m2, r2 = _bn_affine(jnp.sum(s2, axis=0), count, BN_EPS)
    a1, b1 = r1, -m1 * r1
    a2, b2 = r2, -m2 * r2

    out1, out2 = pl.pallas_call(
        _bn_relu_kernel,
        grid=(n, s // ts),
        in_specs=[tile_blk(ts), tile_blk(ts), col_blk, col_blk, col_blk, col_blk],
        out_specs=[tile_blk(ts), tile_blk(ts)],
        out_shape=[
            jax.ShapeDtypeStruct((n, c, s), jnp.float32),
            jax.ShapeDtypeStruct((n, c, s), jnp.float32),
        ],
        compiler_params=pltpu.CompilerParams(
            dimension_semantics=("parallel", "parallel")),
    )(o1_raw, o2_raw, a1, b1, a2, b2)

    return out1.reshape(n, c, h, w), out2.reshape(n, c, h, w)


# ---------------------------------------------------------------------------
# Parameters + plain-JAX reference (for verification)
# ---------------------------------------------------------------------------
def make_params(c, init_weights=(0.9, 0.1), key=jax.random.PRNGKey(0)):
    """Mirrors AttentionSearch._init_weights + default Linear init (deterministic)."""
    a, b = init_weights
    eye = jnp.eye(c, dtype=jnp.float32)
    wf = jnp.concatenate([0.5 * eye, 0.5 * eye], axis=1)   # fusion_conv (C, 2C)
    w1 = jnp.concatenate([a * eye, b * eye], axis=1)       # conv1 (C, 2C)
    w2 = jnp.concatenate([a * eye, b * eye], axis=1)       # conv2 (C, 2C)
    kq, kk, kv, kp, kb = jax.random.split(key, 5)
    lim = 1.0 / (c ** 0.5)
    uni = lambda k_, shape: jax.random.uniform(k_, shape, jnp.float32, -lim, lim)
    return dict(wf=wf, w1=w1, w2=w2,
                wq=uni(kq, (c, c)), wk=uni(kk, (c, c)), wv=uni(kv, (c, c)),
                wp=uni(kp, (c, c)), bp=uni(kb, (c,)))


def _bn_train_ref(x):
    mean = jnp.mean(x, axis=(0, 2), keepdims=True)
    var = jnp.mean(jnp.square(x - mean), axis=(0, 2), keepdims=True)
    return (x - mean) * jax.lax.rsqrt(var + BN_EPS)


def attention_search_ref(feature1, feature2, params):
    n, c, h, w = feature1.shape
    s = h * w
    f1 = feature1.reshape(n, c, s)
    f2 = feature2.reshape(n, c, s)
    wf, w1, w2 = params["wf"], params["w1"], params["w2"]
    wq, wk, wv = params["wq"], params["wk"], params["wv"]
    wp, bp = params["wp"], params["bp"]

    conv = lambda wgt, x: jnp.einsum('oc,ncs->nos', wgt, x)
    fused = _bn_train_ref(conv(wf[:, :c], f1) + conv(wf[:, c:], f2))

    q = conv(wq, fused)
    k = conv(wk, fused)
    v = conv(wv, fused)
    scores = jnp.einsum('ncq,nck->nqk', q, k) * (float(c) ** -0.5)
    p = jax.nn.softmax(scores, axis=-1)
    sa = jnp.einsum('nqk,nck->ncq', p, v)
    sa = conv(wp, sa) + bp[None, :, None]

    o1 = jnp.maximum(_bn_train_ref(conv(w1[:, :c], f1) + conv(w1[:, c:], sa)), 0.0)
    o2 = jnp.maximum(_bn_train_ref(conv(w2[:, :c], f2) + conv(w2[:, c:], sa)), 0.0)
    return o1.reshape(n, c, h, w), o2.reshape(n, c, h, w)


if __name__ == "__main__":
    key = jax.random.PRNGKey(0)
    k1, k2, kp = jax.random.split(key, 3)

    N, C, H, W = 2, 4, 16, 16
    feature1 = jax.random.normal(k1, (N, C, H, W), dtype=jnp.float32)
    feature2 = jax.random.normal(k2, (N, C, H, W), dtype=jnp.float32)
    params = make_params(C, init_weights=(0.9, 0.1), key=kp)

    out1, out2 = jax.jit(attention_search)(feature1, feature2, params)
    jax.block_until_ready((out1, out2))

    r1, r2 = attention_search_ref(feature1, feature2, params)
    assert out1.shape == (N, C, H, W) and out2.shape == (N, C, H, W)
    err1 = float(jnp.max(jnp.abs(out1 - r1)))
    err2 = float(jnp.max(jnp.abs(out2 - r2)))
    assert jnp.allclose(out1, r1, atol=2e-3, rtol=2e-3), err1
    assert jnp.allclose(out2, r2, atol=2e-3, rtol=2e-3), err2

    print("KERNEL_OK")
</pallas_src>

<mosaic_0001>
module attributes {stable_mosaic.version = 11 : i64} {
  func.func @_fusion_stats_kernel(%arg0: i32, %arg1: i32, %arg2: memref<1x4x256xf32, #tpu.memory_space<vmem>>, %arg3: memref<1x4x256xf32, #tpu.memory_space<vmem>>, %arg4: memref<4x4xf32, #tpu.memory_space<vmem>>, %arg5: memref<4x4xf32, #tpu.memory_space<vmem>>, %arg6: memref<1x4x2xf32, #tpu.memory_space<vmem>>) attributes {dimension_semantics = [#tpu.dimension_semantics<parallel>, #tpu.dimension_semantics<arbitrary>], iteration_bounds = array<i64: 2, 1>, scalar_prefetch = 0 : i64, scratch_operands = 0 : i64, tpu.core_type = #tpu.core_type<tc>, window_params = [{transform_indices = @transform_0, window_bounds = array<i64: 1, 4, 256>}, {transform_indices = @transform_1, window_bounds = array<i64: 1, 4, 256>}, {pipeline_mode = #tpu.pipeline_mode<synchronous>, transform_indices = @transform_2, window_bounds = array<i64: 4, 4>}, {pipeline_mode = #tpu.pipeline_mode<synchronous>, transform_indices = @transform_3, window_bounds = array<i64: 4, 4>}, {transform_indices = @transform_4, window_bounds = array<i64: 1, 4, 2>}]} {
    %c0_i32 = arith.constant 0 : i32
    %0 = arith.cmpi eq, %arg1, %c0_i32 : i32
    %1 = arith.extui %0 : i1 to i32
    %c0_i32_0 = arith.constant 0 : i32
    %2 = arith.cmpi ne, %1, %c0_i32_0 : i32
    scf.if %2 {
      %cst_19 = arith.constant 0.000000e+00 : f32
      %24 = vector.broadcast %cst_19 : f32 to vector<4x2xf32>
      %c0_20 = arith.constant 0 : index
      %c0_21 = arith.constant 0 : index
      %c0_22 = arith.constant 0 : index
      %25 = vector.load %arg6[%c0_20, %c0_21, %c0_22] : memref<1x4x2xf32, #tpu.memory_space<vmem>>, vector<1x4x2xf32>
      %26 = vector.shape_cast %25 : vector<1x4x2xf32> to vector<4x2xf32>
      %27 = vector.shape_cast %24 : vector<4x2xf32> to vector<1x4x2xf32>
      tpu.vector_store %arg6[%c0_20, %c0_21, %c0_22], %27 {strides = array<i32>} : memref<1x4x2xf32, #tpu.memory_space<vmem>>, vector<1x4x2xf32>,
    } else {
    }
    %c0 = arith.constant 0 : index
    %c0_1 = arith.constant 0 : index
    %3 = vector.load %arg4[%c0, %c0_1] : memref<4x4xf32, #tpu.memory_space<vmem>>, vector<4x4xf32>
    %c0_2 = arith.constant 0 : index
    %c0_3 = arith.constant 0 : index
    %c0_4 = arith.constant 0 : index
    %4 = vector.load %arg2[%c0_2, %c0_3, %c0_4] : memref<1x4x256xf32, #tpu.memory_space<vmem>>, vector<1x4x256xf32>
    %5 = vector.shape_cast %4 : vector<1x4x256xf32> to vector<4x256xf32>
    %cst = arith.constant dense<0.000000e+00> : vector<4x256xf32>
    %6 = tpu.matmul %3, %5, %cst {dimension_numbers = #tpu.dot_dimension_numbers<[1], [0], [0], [1], [0, 0, 1, 1], [], []>} : vector<4x4xf32>, vector<4x256xf32>, vector<4x256xf32> -> vector<4x256xf32>
    %c0_5 = arith.constant 0 : index
    %c0_6 = arith.constant 0 : index
    %7 = vector.load %arg5[%c0_5, %c0_6] : memref<4x4xf32, #tpu.memory_space<vmem>>, vector<4x4xf32>
    %c0_7 = arith.constant 0 : index
    %c0_8 = arith.constant 0 : index
    %c0_9 = arith.constant 0 : index
    %8 = vector.load %arg3[%c0_7, %c0_8, %c0_9] : memref<1x4x256xf32, #tpu.memory_space<vmem>>, vector<1x4x256xf32>
    %9 = vector.shape_cast %8 : vector<1x4x256xf32> to vector<4x256xf32>
    %cst_10 = arith.constant dense<0.000000e+00> : vector<4x256xf32>
    %10 = tpu.matmul %7, %9, %cst_10 {dimension_numbers = #tpu.dot_dimension_numbers<[1], [0], [0], [1], [0, 0, 1, 1], [], []>} : vector<4x4xf32>, vector<4x256xf32>, vector<4x256xf32> -> vector<4x256xf32>
    %11 = arith.addf %6, %10 : vector<4x256xf32>
    %c0_11 = arith.constant 0 : index
    %c0_12 = arith.constant 0 : index
    %c0_13 = arith.constant 0 : index
    %12 = vector.load %arg6[%c0_11, %c0_12, %c0_13] : memref<1x4x2xf32, #tpu.memory_space<vmem>>, vector<1x4x2xf32>
    %13 = vector.shape_cast %12 : vector<1x4x2xf32> to vector<4x2xf32>
    %cst_14 = arith.constant dense<0.000000e+00> : vector<4xf32>
    %14 = vector.multi_reduction <add>, %11, %cst_14 [1] : vector<4x256xf32> to vector<4xf32>
    %15 = vector.shape_cast %14 : vector<4xf32> to vector<4x1xf32>
    %16 = arith.mulf %11, %11 : vector<4x256xf32>
    %cst_15 = arith.constant dense<0.000000e+00> : vector<4xf32>
    %17 = vector.multi_reduction <add>, %16, %cst_15 [1] : vector<4x256xf32> to vector<4xf32>
    %18 = vector.shape_cast %17 : vector<4xf32> to vector<4x1xf32>
    %19 = tpu.concatenate %15, %18 in 1 : vector<4x1xf32>, vector<4x1xf32> -> vector<4x2xf32>
    %20 = arith.addf %13, %19 : vector<4x2xf32>
    %c0_16 = arith.constant 0 : index
    %c0_17 = arith.constant 0 : index
    %c0_18 = arith.constant 0 : index
    %21 = vector.load %arg6[%c0_16, %c0_17, %c0_18] : memref<1x4x2xf32, #tpu.memory_space<vmem>>, vector<1x4x2xf32>
    %22 = vector.shape_cast %21 : vector<1x4x2xf32> to vector<4x2xf32>
    %23 = vector.shape_cast %20 : vector<4x2xf32> to vector<1x4x2xf32>
    tpu.vector_store %arg6[%c0_16, %c0_17, %c0_18], %23 {strides = array<i32>} : memref<1x4x2xf32, #tpu.memory_space<vmem>>, vector<1x4x2xf32>,
    return
  }
  func.func @transform_0(%arg0: i32, %arg1: i32) -> (i32, i32, i32) {
    %c0_i32 = arith.constant 0 : i32
    %c0_i32_0 = arith.constant 0 : i32
    return %arg0, %c0_i32, %arg1 : i32, i32, i32
  }
  func.func @transform_1(%arg0: i32, %arg1: i32) -> (i32, i32, i32) {
    %c0_i32 = arith.constant 0 : i32
    %c0_i32_0 = arith.constant 0 : i32
    return %arg0, %c0_i32, %arg1 : i32, i32, i32
  }
  func.func @transform_2(%arg0: i32, %arg1: i32) -> (i32, i32) {
    %c0_i32 = arith.constant 0 : i32
    %c0_i32_0 = arith.constant 0 : i32
    %c0_i32_1 = arith.constant 0 : i32
    return %c0_i32, %c0_i32_0 : i32, i32
  }
  func.func @transform_3(%arg0: i32, %arg1: i32) -> (i32, i32) {
    %c0_i32 = arith.constant 0 : i32
    %c0_i32_0 = arith.constant 0 : i32
    %c0_i32_1 = arith.constant 0 : i32
    return %c0_i32, %c0_i32_0 : i32, i32
  }
  func.func @transform_4(%arg0: i32, %arg1: i32) -> (i32, i32, i32) {
    %c0_i32 = arith.constant 0 : i32
    %c0_i32_0 = arith.constant 0 : i32
    %c0_i32_1 = arith.constant 0 : i32
    return %arg0, %c0_i32, %c0_i32_0 : i32, i32, i32
  }
}

module attributes {stable_mosaic.version = 11 : i64} {
  func.func @_attention_kernel(%arg0: i32, %arg1: i32, %arg2: memref<1x4x256xf32, #tpu.memory_space<vmem>>, %arg3: memref<1x4x256xf32, #tpu.memory_space<vmem>>, %arg4: memref<4x4xf32, #tpu.memory_space<vmem>>, %arg5: memref<4x4xf32, #tpu.memory_space<vmem>>, %arg6: memref<4x4xf32, #tpu.memory_space<vmem>>, %arg7: memref<4x1xf32, #tpu.memory_space<vmem>>, %arg8: memref<4x4xf32, #tpu.memory_space<vmem>>, %arg9: memref<4x4xf32, #tpu.memory_space<vmem>>, %arg10: memref<4x4xf32, #tpu.memory_space<vmem>>, %arg11: memref<4x4xf32, #tpu.memory_space<vmem>>, %arg12: memref<4x1xf32, #tpu.memory_space<vmem>>, %arg13: memref<4x4xf32, #tpu.memory_space<vmem>>, %arg14: memref<4x4xf32, #tpu.memory_space<vmem>>, %arg15: memref<4x1xf32, #tpu.memory_space<vmem>>, %arg16: memref<1x4x256xf32, #tpu.memory_space<vmem>>, %arg17: memref<1x4x256xf32, #tpu.memory_space<vmem>>, %arg18: memref<1x4x2xf32, #tpu.memory_space<vmem>>, %arg19: memref<1x4x2xf32, #tpu.memory_space<vmem>>, %arg20: memref<4x256xf32, #tpu.memory_space<vmem>>, %arg21: memref<256x4xbf16, #tpu.memory_space<vmem>>, %arg22: memref<4x256xbf16, #tpu.memory_space<vmem>>) attributes {dimension_semantics = [#tpu.dimension_semantics<parallel>, #tpu.dimension_semantics<arbitrary>], iteration_bounds = array<i64: 2, 1>, scalar_prefetch = 0 : i64, scratch_operands = 3 : i64, tpu.core_type = #tpu.core_type<tc>, window_params = [{transform_indices = @transform_0, window_bounds = array<i64: 1, 4, 256>}, {transform_indices = @transform_1, window_bounds = array<i64: 1, 4, 256>}, {pipeline_mode = #tpu.pipeline_mode<synchronous>, transform_indices = @transform_2, window_bounds = array<i64: 4, 4>}, {pipeline_mode = #tpu.pipeline_mode<synchronous>, transform_indices = @transform_3, window_bounds = array<i64: 4, 4>}, {pipeline_mode = #tpu.pipeline_mode<synchronous>, transform_indices = @transform_4, window_bounds = array<i64: 4, 4>}, {pipeline_mode = #tpu.pipeline_mode<synchronous>, transform_indices = @transform_5, window_bounds = array<i64: 4, 1>}, {pipeline_mode = #tpu.pipeline_mode<synchronous>, transform_indices = @transform_6, window_bounds = array<i64: 4, 4>}, {pipeline_mode = #tpu.pipeline_mode<synchronous>, transform_indices = @transform_7, window_bounds = array<i64: 4, 4>}, {pipeline_mode = #tpu.pipeline_mode<synchronous>, transform_indices = @transform_8, window_bounds = array<i64: 4, 4>}, {pipeline_mode = #tpu.pipeline_mode<synchronous>, transform_indices = @transform_9, window_bounds = array<i64: 4, 4>}, {pipeline_mode = #tpu.pipeline_mode<synchronous>, transform_indices = @transform_10, window_bounds = array<i64: 4, 1>}, {pipeline_mode = #tpu.pipeline_mode<synchronous>, transform_indices = @transform_11, window_bounds = array<i64: 4, 4>}, {pipeline_mode = #tpu.pipeline_mode<synchronous>, transform_indices = @transform_12, window_bounds = array<i64: 4, 4>}, {pipeline_mode = #tpu.pipeline_mode<synchronous>, transform_indices = @transform_13, window_bounds = array<i64: 4, 1>}, {transform_indices = @transform_14, window_bounds = array<i64: 1, 4, 256>}, {transform_indices = @transform_15, window_bounds = array<i64: 1, 4, 256>}, {transform_indices = @transform_16, window_bounds = array<i64: 1, 4, 2>}, {transform_indices = @transform_17, window_bounds = array<i64: 1, 4, 2>}]} {
    %c0_i32 = arith.constant 0 : i32
    %0 = arith.cmpi eq, %arg1, %c0_i32 : i32
    %1 = arith.extui %0 : i1 to i32
    %c0_i32_0 = arith.constant 0 : i32
    %2 = arith.cmpi ne, %1, %c0_i32_0 : i32
    scf.if %2 {
      %cst_55 = arith.constant 0.000000e+00 : f32
      %80 = vector.broadcast %cst_55 : f32 to vector<4x2xf32>
      %c0_56 = arith.constant 0 : index
      %c0_57 = arith.constant 0 : index
      %c0_58 = arith.constant 0 : index
      %81 = vector.load %arg18[%c0_56, %c0_57, %c0_58] : memref<1x4x2xf32, #tpu.memory_space<vmem>>, vector<1x4x2xf32>
      %82 = vector.shape_cast %81 : vector<1x4x2xf32> to vector<4x2xf32>
      %83 = vector.shape_cast %80 : vector<4x2xf32> to vector<1x4x2xf32>
      tpu.vector_store %arg18[%c0_56, %c0_57, %c0_58], %83 {strides = array<i32>} : memref<1x4x2xf32, #tpu.memory_space<vmem>>, vector<1x4x2xf32>,
      %cst_59 = arith.constant 0.000000e+00 : f32
      %84 = vector.broadcast %cst_59 : f32 to vector<4x2xf32>
      %c0_60 = arith.constant 0 : index
      %c0_61 = arith.constant 0 : index
      %c0_62 = arith.constant 0 : index
      %85 = vector.load %arg19[%c0_60, %c0_61, %c0_62] : memref<1x4x2xf32, #tpu.memory_space<vmem>>, vector<1x4x2xf32>
      %86 = vector.shape_cast %85 : vector<1x4x2xf32> to vector<4x2xf32>
      %87 = vector.shape_cast %84 : vector<4x2xf32> to vector<1x4x2xf32>
      tpu.vector_store %arg19[%c0_60, %c0_61, %c0_62], %87 {strides = array<i32>} : memref<1x4x2xf32, #tpu.memory_space<vmem>>, vector<1x4x2xf32>,
      %c0_63 = arith.constant 0 : index
      %c0_64 = arith.constant 0 : index
      %88 = vector.load %arg4[%c0_63, %c0_64] : memref<4x4xf32, #tpu.memory_space<vmem>>, vector<4x4xf32>
      %c0_65 = arith.constant 0 : index
      %c0_66 = arith.constant 0 : index
      %c0_67 = arith.constant 0 : index
      %89 = vector.load %arg2[%c0_65, %c0_66, %c0_67] : memref<1x4x256xf32, #tpu.memory_space<vmem>>, vector<1x4x256xf32>
      %90 = vector.shape_cast %89 : vector<1x4x256xf32> to vector<4x256xf32>
      %cst_68 = arith.constant dense<0.000000e+00> : vector<4x256xf32>
      %91 = tpu.matmul %88, %90, %cst_68 {dimension_numbers = #tpu.dot_dimension_numbers<[1], [0], [0], [1], [0, 0, 1, 1], [], []>} : vector<4x4xf32>, vector<4x256xf32>, vector<4x256xf32> -> vector<4x256xf32>
      %c0_69 = arith.constant 0 : index
      %c0_70 = arith.constant 0 : index
      %92 = vector.load %arg5[%c0_69, %c0_70] : memref<4x4xf32, #tpu.memory_space<vmem>>, vector<4x4xf32>
      %c0_71 = arith.constant 0 : index
      %c0_72 = arith.constant 0 : index
      %c0_73 = arith.constant 0 : index
      %93 = vector.load %arg3[%c0_71, %c0_72, %c0_73] : memref<1x4x256xf32, #tpu.memory_space<vmem>>, vector<1x4x256xf32>
      %94 = vector.shape_cast %93 : vector<1x4x256xf32> to vector<4x256xf32>
      %cst_74 = arith.constant dense<0.000000e+00> : vector<4x256xf32>
      %95 = tpu.matmul %92, %94, %cst_74 {dimension_numbers = #tpu.dot_dimension_numbers<[1], [0], [0], [1], [0, 0, 1, 1], [], []>} : vector<4x4xf32>, vector<4x256xf32>, vector<4x256xf32> -> vector<4x256xf32>
      %96 = arith.addf %91, %95 : vector<4x256xf32>
      %c0_75 = arith.constant 0 : index
      %c0_76 = arith.constant 0 : index
      %97 = vector.load %arg20[%c0_75, %c0_76] : memref<4x256xf32, #tpu.memory_space<vmem>>, vector<4x256xf32>
      tpu.vector_store %arg20[%c0_75, %c0_76], %96 {strides = array<i32>} : memref<4x256xf32, #tpu.memory_space<vmem>>, vector<4x256xf32>,
      %c0_77 = arith.constant 0 : index
      %c0_78 = arith.constant 0 : index
      %98 = vector.load %arg8[%c0_77, %c0_78] : memref<4x4xf32, #tpu.memory_space<vmem>>, vector<4x4xf32>
      %cst_79 = arith.constant dense<0.000000e+00> : vector<4x256xf32>
      %99 = tpu.matmul %98, %96, %cst_79 {dimension_numbers = #tpu.dot_dimension_numbers<[1], [0], [0], [1], [0, 0, 1, 1], [], []>} : vector<4x4xf32>, vector<4x256xf32>, vector<4x256xf32> -> vector<4x256xf32>
      %100 = tpu.transpose %99, [1, 0] : vector<4x256xf32> -> vector<256x4xf32>
      %101 = arith.truncf %100 : vector<256x4xf32> to vector<256x4xbf16>
      %c0_80 = arith.constant 0 : index
      %c0_81 = arith.constant 0 : index
      %102 = vector.load %arg21[%c0_80, %c0_81] : memref<256x4xbf16, #tpu.memory_space<vmem>>, vector<256x4xbf16>
      tpu.vector_store %arg21[%c0_80, %c0_81], %101 {strides = array<i32>} : memref<256x4xbf16, #tpu.memory_space<vmem>>, vector<256x4xbf16>,
      %c0_82 = arith.constant 0 : index
      %c0_83 = arith.constant 0 : index
      %103 = vector.load %arg9[%c0_82, %c0_83] : memref<4x4xf32, #tpu.memory_space<vmem>>, vector<4x4xf32>
      %cst_84 = arith.constant dense<0.000000e+00> : vector<4x256xf32>
      %104 = tpu.matmul %103, %96, %cst_84 {dimension_numbers = #tpu.dot_dimension_numbers<[1], [0], [0], [1], [0, 0, 1, 1], [], []>} : vector<4x4xf32>, vector<4x256xf32>, vector<4x256xf32> -> vector<4x256xf32>
      %105 = arith.truncf %104 : vector<4x256xf32> to vector<4x256xbf16>
      %c0_85 = arith.constant 0 : index
      %c0_86 = arith.constant 0 : index
      %106 = vector.load %arg22[%c0_85, %c0_86] : memref<4x256xbf16, #tpu.memory_space<vmem>>, vector<4x256xbf16>
      tpu.vector_store %arg22[%c0_85, %c0_86], %105 {strides = array<i32>} : memref<4x256xbf16, #tpu.memory_space<vmem>>, vector<4x256xbf16>,
    } else {
    }
    %c256_i32 = arith.constant 256 : i32
    %3 = arith.muli %arg1, %c256_i32 : i32
    %4 = tpu.assume_multiple %3, 128 : i32
    %c0 = arith.constant 0 : index
    %c0_1 = arith.constant 0 : index
    %5 = arith.index_cast %4 : i32 to index
    %6 = vector.load %arg2[%c0, %c0_1, %5] : memref<1x4x256xf32, #tpu.memory_space<vmem>>, vector<1x4x256xf32>
    %7 = vector.shape_cast %6 : vector<1x4x256xf32> to vector<4x256xf32>
    %c0_2 = arith.constant 0 : index
    %c0_3 = arith.constant 0 : index
    %8 = arith.index_cast %4 : i32 to index
    %9 = vector.load %arg3[%c0_2, %c0_3, %8] : memref<1x4x256xf32, #tpu.memory_space<vmem>>, vector<1x4x256xf32>
    %10 = vector.shape_cast %9 : vector<1x4x256xf32> to vector<4x256xf32>
    %c0_4 = arith.constant 0 : index
    %11 = arith.index_cast %4 : i32 to index
    %12 = vector.load %arg20[%c0_4, %11] : memref<4x256xf32, #tpu.memory_space<vmem>>, vector<4x256xf32>
    %c0_5 = arith.constant 0 : index
    %c0_6 = arith.constant 0 : index
    %13 = vector.load %arg6[%c0_5, %c0_6] : memref<4x4xf32, #tpu.memory_space<vmem>>, vector<4x4xf32>
    %cst = arith.constant dense<0.000000e+00> : vector<4x256xf32>
    %14 = tpu.matmul %13, %12, %cst {dimension_numbers = #tpu.dot_dimension_numbers<[1], [0], [0], [1], [0, 0, 1, 1], [], []>} : vector<4x4xf32>, vector<4x256xf32>, vector<4x256xf32> -> vector<4x256xf32>
    %c0_7 = arith.constant 0 : index
    %c0_8 = arith.constant 0 : index
    %15 = vector.load %arg7[%c0_7, %c0_8] : memref<4x1xf32, #tpu.memory_space<vmem>>, vector<4x1xf32>
    %16 = vector.broadcast %15 : vector<4x1xf32> to vector<4x256xf32>
    %17 = arith.addf %14, %16 : vector<4x256xf32>
    %18 = arith.truncf %17 : vector<4x256xf32> to vector<4x256xbf16>
    %c0_9 = arith.constant 0 : index
    %c0_10 = arith.constant 0 : index
    %19 = vector.load %arg21[%c0_9, %c0_10] : memref<256x4xbf16, #tpu.memory_space<vmem>>, vector<256x4xbf16>
    %cst_11 = arith.constant dense<0.000000e+00> : vector<256x256xf32>
    %20 = tpu.matmul %19, %18, %cst_11 {dimension_numbers = #tpu.dot_dimension_numbers<[1], [0], [0], [1], [0, 0, 1, 1], [], []>} : vector<256x4xbf16>, vector<4x256xbf16>, vector<256x256xf32> -> vector<256x256xf32>
    %cst_12 = arith.constant dense<0xFF800000> : vector<256xf32>
    %21 = vector.multi_reduction <maximumf>, %20, %cst_12 [0] : vector<256x256xf32> to vector<256xf32>
    %22 = vector.shape_cast %21 : vector<256xf32> to vector<1x256xf32>
    %23 = vector.broadcast %22 : vector<1x256xf32> to vector<256x256xf32>
    %24 = arith.subf %20, %23 : vector<256x256xf32>
    %25 = math.exp %24 : vector<256x256xf32>
    %cst_13 = arith.constant dense<0.000000e+00> : vector<256xf32>
    %26 = vector.multi_reduction <add>, %25, %cst_13 [0] : vector<256x256xf32> to vector<256xf32>
    %27 = vector.shape_cast %26 : vector<256xf32> to vector<1x256xf32>
    %c0_14 = arith.constant 0 : index
    %c0_15 = arith.constant 0 : index
    %28 = vector.load %arg22[%c0_14, %c0_15] : memref<4x256xbf16, #tpu.memory_space<vmem>>, vector<4x256xbf16>
    %29 = arith.truncf %25 : vector<256x256xf32> to vector<256x256xbf16>
    %cst_16 = arith.constant dense<0.000000e+00> : vector<4x256xf32>
    %30 = tpu.matmul %28, %29, %cst_16 {dimension_numbers = #tpu.dot_dimension_numbers<[1], [0], [0], [1], [0, 0, 1, 1], [], []>} : vector<4x256xbf16>, vector<256x256xbf16>, vector<4x256xf32> -> vector<4x256xf32>
    %31 = tpu.reciprocal %27 {approx = true} : vector<1x256xf32> -> vector<1x256xf32>
    %32 = vector.broadcast %31 : vector<1x256xf32> to vector<4x256xf32>
    %33 = arith.mulf %30, %32 : vector<4x256xf32>
    %c0_17 = arith.constant 0 : index
    %c0_18 = arith.constant 0 : index
    %34 = vector.load %arg10[%c0_17, %c0_18] : memref<4x4xf32, #tpu.memory_space<vmem>>, vector<4x4xf32>
    %cst_19 = arith.constant dense<0.000000e+00> : vector<4x256xf32>
    %35 = tpu.matmul %34, %7, %cst_19 {dimension_numbers = #tpu.dot_dimension_numbers<[1], [0], [0], [1], [0, 0, 1, 1], [], []>} : vector<4x4xf32>, vector<4x256xf32>, vector<4x256xf32> -> vector<4x256xf32>
    %c0_20 = arith.constant 0 : index
    %c0_21 = arith.constant 0 : index
    %36 = vector.load %arg11[%c0_20, %c0_21] : memref<4x4xf32, #tpu.memory_space<vmem>>, vector<4x4xf32>
    %cst_22 = arith.constant dense<0.000000e+00> : vector<4x256xf32>
    %37 = tpu.matmul %36, %33, %cst_22 {dimension_numbers = #tpu.dot_dimension_numbers<[1], [0], [0], [1], [0, 0, 1, 1], [], []>} : vector<4x4xf32>, vector<4x256xf32>, vector<4x256xf32> -> vector<4x256xf32>
    %38 = arith.addf %35, %37 : vector<4x256xf32>
    %c0_23 = arith.constant 0 : index
    %c0_24 = arith.constant 0 : index
    %39 = vector.load %arg12[%c0_23, %c0_24] : memref<4x1xf32, #tpu.memory_space<vmem>>, vector<4x1xf32>
    %40 = vector.broadcast %39 : vector<4x1xf32> to vector<4x256xf32>
    %41 = arith.addf %38, %40 : vector<4x256xf32>
    %c0_25 = arith.constant 0 : index
    %c0_26 = arith.constant 0 : index
    %42 = vector.load %arg13[%c0_25, %c0_26] : memref<4x4xf32, #tpu.memory_space<vmem>>, vector<4x4xf32>
    %cst_27 = arith.constant dense<0.000000e+00> : vector<4x256xf32>
    %43 = tpu.matmul %42, %10, %cst_27 {dimension_numbers = #tpu.dot_dimension_numbers<[1], [0], [0], [1], [0, 0, 1, 1], [], []>} : vector<4x4xf32>, vector<4x256xf32>, vector<4x256xf32> -> vector<4x256xf32>
    %c0_28 = arith.constant 0 : index
    %c0_29 = arith.constant 0 : index
    %44 = vector.load %arg14[%c0_28, %c0_29] : memref<4x4xf32, #tpu.memory_space<vmem>>, vector<4x4xf32>
    %cst_30 = arith.constant dense<0.000000e+00> : vector<4x256xf32>
    %45 = tpu.matmul %44, %33, %cst_30 {dimension_numbers = #tpu.dot_dimension_numbers<[1], [0], [0], [1], [0, 0, 1, 1], [], []>} : vector<4x4xf32>, vector<4x256xf32>, vector<4x256xf32> -> vector<4x256xf32>
    %46 = arith.addf %43, %45 : vector<4x256xf32>
    %c0_31 = arith.constant 0 : index
    %c0_32 = arith.constant 0 : index
    %47 = vector.load %arg15[%c0_31, %c0_32] : memref<4x1xf32, #tpu.memory_space<vmem>>, vector<4x1xf32>
    %48 = vector.broadcast %47 : vector<4x1xf32> to vector<4x256xf32>
    %49 = arith.addf %46, %48 : vector<4x256xf32>
    %c0_33 = arith.constant 0 : index
    %c0_34 = arith.constant 0 : index
    %c0_35 = arith.constant 0 : index
    %50 = vector.load %arg16[%c0_33, %c0_34, %c0_35] : memref<1x4x256xf32, #tpu.memory_space<vmem>>, vector<1x4x256xf32>
    %51 = vector.shape_cast %50 : vector<1x4x256xf32> to vector<4x256xf32>
    %52 = vector.shape_cast %41 : vector<4x256xf32> to vector<1x4x256xf32>
    tpu.vector_store %arg16[%c0_33, %c0_34, %c0_35], %52 {strides = array<i32>} : memref<1x4x256xf32, #tpu.memory_space<vmem>>, vector<1x4x256xf32>,
    %c0_36 = arith.constant 0 : index
    %c0_37 = arith.constant 0 : index
    %c0_38 = arith.constant 0 : index
    %53 = vector.load %arg17[%c0_36, %c0_37, %c0_38] : memref<1x4x256xf32, #tpu.memory_space<vmem>>, vector<1x4x256xf32>
    %54 = vector.shape_cast %53 : vector<1x4x256xf32> to vector<4x256xf32>
    %55 = vector.shape_cast %49 : vector<4x256xf32> to vector<1x4x256xf32>
    tpu.vector_store %arg17[%c0_36, %c0_37, %c0_38], %55 {strides = array<i32>} : memref<1x4x256xf32, #tpu.memory_space<vmem>>, vector<1x4x256xf32>,
    %c0_39 = arith.constant 0 : index
    %c0_40 = arith.constant 0 : index
    %c0_41 = arith.constant 0 : index
    %56 = vector.load %arg18[%c0_39, %c0_40, %c0_41] : memref<1x4x2xf32, #tpu.memory_space<vmem>>, vector<1x4x2xf32>
    %57 = vector.shape_cast %56 : vector<1x4x2xf32> to vector<4x2xf32>
    %cst_42 = arith.constant dense<0.000000e+00> : vector<4xf32>
    %58 = vector.multi_reduction <add>, %41, %cst_42 [1] : vector<4x256xf32> to vector<4xf32>
    %59 = vector.shape_cast %58 : vector<4xf32> to vector<4x1xf32>
    %60 = arith.mulf %41, %41 : vector<4x256xf32>
    %cst_43 = arith.constant dense<0.000000e+00> : vector<4xf32>
    %61 = vector.multi_reduction <add>, %60, %cst_43 [1] : vector<4x256xf32> to vector<4xf32>
    %62 = vector.shape_cast %61 : vector<4xf32> to vector<4x1xf32>
    %63 = tpu.concatenate %59, %62 in 1 : vector<4x1xf32>, vector<4x1xf32> -> vector<4x2xf32>
    %64 = arith.addf %57, %63 : vector<4x2xf32>
    %c0_44 = arith.constant 0 : index
    %c0_45 = arith.constant 0 : index
    %c0_46 = arith.constant 0 : index
    %65 = vector.load %arg18[%c0_44, %c0_45, %c0_46] : memref<1x4x2xf32, #tpu.memory_space<vmem>>, vector<1x4x2xf32>
    %66 = vector.shape_cast %65 : vector<1x4x2xf32> to vector<4x2xf32>
    %67 = vector.shape_cast %64 : vector<4x2xf32> to vector<1x4x2xf32>
    tpu.vector_store %arg18[%c0_44, %c0_45, %c0_46], %67 {strides = array<i32>} : memref<1x4x2xf32, #tpu.memory_space<vmem>>, vector<1x4x2xf32>,
    %c0_47 = arith.constant 0 : index
    %c0_48 = arith.constant 0 : index
    %c0_49 = arith.constant 0 : index
    %68 = vector.load %arg19[%c0_47, %c0_48, %c0_49] : memref<1x4x2xf32, #tpu.memory_space<vmem>>, vector<1x4x2xf32>
    %69 = vector.shape_cast %68 : vector<1x4x2xf32> to vector<4x2xf32>
    %cst_50 = arith.constant dense<0.000000e+00> : vector<4xf32>
    %70 = vector.multi_reduction <add>, %49, %cst_50 [1] : vector<4x256xf32> to vector<4xf32>
    %71 = vector.shape_cast %70 : vector<4xf32> to vector<4x1xf32>
    %72 = arith.mulf %49, %49 : vector<4x256xf32>
    %cst_51 = arith.constant dense<0.000000e+00> : vector<4xf32>
    %73 = vector.multi_reduction <add>, %72, %cst_51 [1] : vector<4x256xf32> to vector<4xf32>
    %74 = vector.shape_cast %73 : vector<4xf32> to vector<4x1xf32>
    %75 = tpu.concatenate %71, %74 in 1 : vector<4x1xf32>, vector<4x1xf32> -> vector<4x2xf32>
    %76 = arith.addf %69, %75 : vector<4x2xf32>
    %c0_52 = arith.constant 0 : index
    %c0_53 = arith.constant 0 : index
    %c0_54 = arith.constant 0 : index
    %77 = vector.load %arg19[%c0_52, %c0_53, %c0_54] : memref<1x4x2xf32, #tpu.memory_space<vmem>>, vector<1x4x2xf32>
    %78 = vector.shape_cast %77 : vector<1x4x2xf32> to vector<4x2xf32>
    %79 = vector.shape_cast %76 : vector<4x2xf32> to vector<1x4x2xf32>
    tpu.vector_store %arg19[%c0_52, %c0_53, %c0_54], %79 {strides = array<i32>} : memref<1x4x2xf32, #tpu.memory_space<vmem>>, vector<1x4x2xf32>,
    return
  }
  func.func @transform_0(%arg0: i32, %arg1: i32) -> (i32, i32, i32) {
    %c0_i32 = arith.constant 0 : i32
    %c0_i32_0 = arith.constant 0 : i32
    %c0_i32_1 = arith.constant 0 : i32
    return %arg0, %c0_i32, %c0_i32_0 : i32, i32, i32
  }
  func.func @transform_1(%arg0: i32, %arg1: i32) -> (i32, i32, i32) {
    %c0_i32 = arith.constant 0 : i32
    %c0_i32_0 = arith.constant 0 : i32
    %c0_i32_1 = arith.constant 0 : i32
    return %arg0, %c0_i32, %c0_i32_0 : i32, i32, i32
  }
  func.func @transform_2(%arg0: i32, %arg1: i32) -> (i32, i32) {
    %c0_i32 = arith.constant 0 : i32
    %c0_i32_0 = arith.constant 0 : i32
    %c0_i32_1 = arith.constant 0 : i32
    return %c0_i32, %c0_i32_0 : i32, i32
  }
  func.func @transform_3(%arg0: i32, %arg1: i32) -> (i32, i32) {
    %c0_i32 = arith.constant 0 : i32
    %c0_i32_0 = arith.constant 0 : i32
    %c0_i32_1 = arith.constant 0 : i32
    return %c0_i32, %c0_i32_0 : i32, i32
  }
  func.func @transform_4(%arg0: i32, %arg1: i32) -> (i32, i32) {
    %c0_i32 = arith.constant 0 : i32
    %c0_i32_0 = arith.constant 0 : i32
    %c0_i32_1 = arith.constant 0 : i32
    return %c0_i32, %c0_i32_0 : i32, i32
  }
  func.func @transform_5(%arg0: i32, %arg1: i32) -> (i32, i32) {
    %c0_i32 = arith.constant 0 : i32
    %c0_i32_0 = arith.constant 0 : i32
    %c0_i32_1 = arith.constant 0 : i32
    return %c0_i32, %c0_i32_0 : i32, i32
  }
  func.func @transform_6(%arg0: i32, %arg1: i32) -> (i32, i32) {
    %c0_i32 = arith.constant 0 : i32
    %c0_i32_0 = arith.constant 0 : i32
    %c0_i32_1 = arith.constant 0 : i32
    return %c0_i32, %c0_i32_0 : i32, i32
  }
  func.func @transform_7(%arg0: i32, %arg1: i32) -> (i32, i32) {
    %c0_i32 = arith.constant 0 : i32
    %c0_i32_0 = arith.constant 0 : i32
    %c0_i32_1 = arith.constant 0 : i32
    return %c0_i32, %c0_i32_0 : i32, i32
  }
  func.func @transform_8(%arg0: i32, %arg1: i32) -> (i32, i32) {
    %c0_i32 = arith.constant 0 : i32
    %c0_i32_0 = arith.constant 0 : i32
    %c0_i32_1 = arith.constant 0 : i32
    return %c0_i32, %c0_i32_0 : i32, i32
  }
  func.func @transform_9(%arg0: i32, %arg1: i32) -> (i32, i32) {
    %c0_i32 = arith.constant 0 : i32
    %c0_i32_0 = arith.constant 0 : i32
    %c0_i32_1 = arith.constant 0 : i32
    return %c0_i32, %c0_i32_0 : i32, i32
  }
  func.func @transform_10(%arg0: i32, %arg1: i32) -> (i32, i32) {
    %c0_i32 = arith.constant 0 : i32
    %c0_i32_0 = arith.constant 0 : i32
    %c0_i32_1 = arith.constant 0 : i32
    return %c0_i32, %c0_i32_0 : i32, i32
  }
  func.func @transform_11(%arg0: i32, %arg1: i32) -> (i32, i32) {
    %c0_i32 = arith.constant 0 : i32
    %c0_i32_0 = arith.constant 0 : i32
    %c0_i32_1 = arith.constant 0 : i32
    return %c0_i32, %c0_i32_0 : i32, i32
  }
  func.func @transform_12(%arg0: i32, %arg1: i32) -> (i32, i32) {
    %c0_i32 = arith.constant 0 : i32
    %c0_i32_0 = arith.constant 0 : i32
    %c0_i32_1 = arith.constant 0 : i32
    return %c0_i32, %c0_i32_0 : i32, i32
  }
  func.func @transform_13(%arg0: i32, %arg1: i32) -> (i32, i32) {
    %c0_i32 = arith.constant 0 : i32
    %c0_i32_0 = arith.constant 0 : i32
    %c0_i32_1 = arith.constant 0 : i32
    return %c0_i32, %c0_i32_0 : i32, i32
  }
  func.func @transform_14(%arg0: i32, %arg1: i32) -> (i32, i32, i32) {
    %c0_i32 = arith.constant 0 : i32
    %c0_i32_0 = arith.constant 0 : i32
    return %arg0, %c0_i32, %arg1 : i32, i32, i32
  }
  func.func @transform_15(%arg0: i32, %arg1: i32) -> (i32, i32, i32) {
    %c0_i32 = arith.constant 0 : i32
    %c0_i32_0 = arith.constant 0 : i32
    return %arg0, %c0_i32, %arg1 : i32, i32, i32
  }
  func.func @transform_16(%arg0: i32, %arg1: i32) -> (i32, i32, i32) {
    %c0_i32 = arith.constant 0 : i32
    %c0_i32_0 = arith.constant 0 : i32
    %c0_i32_1 = arith.constant 0 : i32
    return %arg0, %c0_i32, %c0_i32_0 : i32, i32, i32
  }
  func.func @transform_17(%arg0: i32, %arg1: i32) -> (i32, i32, i32) {
    %c0_i32 = arith.constant 0 : i32
    %c0_i32_0 = arith.constant 0 : i32
    %c0_i32_1 = arith.constant 0 : i32
    return %arg0, %c0_i32, %c0_i32_0 : i32, i32, i32
  }
}

module attributes {stable_mosaic.version = 11 : i64} {
  func.func @_bn_relu_kernel(%arg0: i32, %arg1: i32, %arg2: memref<1x4x256xf32, #tpu.memory_space<vmem>>, %arg3: memref<1x4x256xf32, #tpu.memory_space<vmem>>, %arg4: memref<4x1xf32, #tpu.memory_space<vmem>>, %arg5: memref<4x1xf32, #tpu.memory_space<vmem>>, %arg6: memref<4x1xf32, #tpu.memory_space<vmem>>, %arg7: memref<4x1xf32, #tpu.memory_space<vmem>>, %arg8: memref<1x4x256xf32, #tpu.memory_space<vmem>>, %arg9: memref<1x4x256xf32, #tpu.memory_space<vmem>>) attributes {dimension_semantics = [#tpu.dimension_semantics<parallel>, #tpu.dimension_semantics<parallel>], iteration_bounds = array<i64: 2, 1>, scalar_prefetch = 0 : i64, scratch_operands = 0 : i64, tpu.core_type = #tpu.core_type<tc>, window_params = [{transform_indices = @transform_0, window_bounds = array<i64: 1, 4, 256>}, {transform_indices = @transform_1, window_bounds = array<i64: 1, 4, 256>}, {pipeline_mode = #tpu.pipeline_mode<synchronous>, transform_indices = @transform_2, window_bounds = array<i64: 4, 1>}, {pipeline_mode = #tpu.pipeline_mode<synchronous>, transform_indices = @transform_3, window_bounds = array<i64: 4, 1>}, {pipeline_mode = #tpu.pipeline_mode<synchronous>, transform_indices = @transform_4, window_bounds = array<i64: 4, 1>}, {pipeline_mode = #tpu.pipeline_mode<synchronous>, transform_indices = @transform_5, window_bounds = array<i64: 4, 1>}, {transform_indices = @transform_6, window_bounds = array<i64: 1, 4, 256>}, {transform_indices = @transform_7, window_bounds = array<i64: 1, 4, 256>}]} {
    %c0 = arith.constant 0 : index
    %c0_0 = arith.constant 0 : index
    %c0_1 = arith.constant 0 : index
    %0 = vector.load %arg2[%c0, %c0_0, %c0_1] : memref<1x4x256xf32, #tpu.memory_space<vmem>>, vector<1x4x256xf32>
    %1 = vector.shape_cast %0 : vector<1x4x256xf32> to vector<4x256xf32>
    %c0_2 = arith.constant 0 : index
    %c0_3 = arith.constant 0 : index
    %2 = vector.load %arg4[%c0_2, %c0_3] : memref<4x1xf32, #tpu.memory_space<vmem>>, vector<4x1xf32>
    %3 = vector.broadcast %2 : vector<4x1xf32> to vector<4x256xf32>
    %4 = arith.mulf %1, %3 : vector<4x256xf32>
    %c0_4 = arith.constant 0 : index
    %c0_5 = arith.constant 0 : index
    %5 = vector.load %arg5[%c0_4, %c0_5] : memref<4x1xf32, #tpu.memory_space<vmem>>, vector<4x1xf32>
    %6 = vector.broadcast %5 : vector<4x1xf32> to vector<4x256xf32>
    %7 = arith.addf %4, %6 : vector<4x256xf32>
    %cst = arith.constant 0.000000e+00 : f32
    %8 = vector.broadcast %cst : f32 to vector<4x256xf32>
    %9 = arith.maximumf %7, %8 : vector<4x256xf32>
    %c0_6 = arith.constant 0 : index
    %c0_7 = arith.constant 0 : index
    %c0_8 = arith.constant 0 : index
    %10 = vector.load %arg8[%c0_6, %c0_7, %c0_8] : memref<1x4x256xf32, #tpu.memory_space<vmem>>, vector<1x4x256xf32>
    %11 = vector.shape_cast %10 : vector<1x4x256xf32> to vector<4x256xf32>
    %12 = vector.shape_cast %9 : vector<4x256xf32> to vector<1x4x256xf32>
    tpu.vector_store %arg8[%c0_6, %c0_7, %c0_8], %12 {strides = array<i32>} : memref<1x4x256xf32, #tpu.memory_space<vmem>>, vector<1x4x256xf32>,
    %c0_9 = arith.constant 0 : index
    %c0_10 = arith.constant 0 : index
    %c0_11 = arith.constant 0 : index
    %13 = vector.load %arg3[%c0_9, %c0_10, %c0_11] : memref<1x4x256xf32, #tpu.memory_space<vmem>>, vector<1x4x256xf32>
    %14 = vector.shape_cast %13 : vector<1x4x256xf32> to vector<4x256xf32>
    %c0_12 = arith.constant 0 : index
    %c0_13 = arith.constant 0 : index
    %15 = vector.load %arg6[%c0_12, %c0_13] : memref<4x1xf32, #tpu.memory_space<vmem>>, vector<4x1xf32>
    %16 = vector.broadcast %15 : vector<4x1xf32> to vector<4x256xf32>
    %17 = arith.mulf %14, %16 : vector<4x256xf32>
    %c0_14 = arith.constant 0 : index
    %c0_15 = arith.constant 0 : index
    %18 = vector.load %arg7[%c0_14, %c0_15] : memref<4x1xf32, #tpu.memory_space<vmem>>, vector<4x1xf32>
    %19 = vector.broadcast %18 : vector<4x1xf32> to vector<4x256xf32>
    %20 = arith.addf %17, %19 : vector<4x256xf32>
    %cst_16 = arith.constant 0.000000e+00 : f32
    %21 = vector.broadcast %cst_16 : f32 to vector<4x256xf32>
    %22 = arith.maximumf %20, %21 : vector<4x256xf32>
    %c0_17 = arith.constant 0 : index
    %c0_18 = arith.constant 0 : index
    %c0_19 = arith.constant 0 : index
    %23 = vector.load %arg9[%c0_17, %c0_18, %c0_19] : memref<1x4x256xf32, #tpu.memory_space<vmem>>, vector<1x4x256xf32>
    %24 = vector.shape_cast %23 : vector<1x4x256xf32> to vector<4x256xf32>
    %25 = vector.shape_cast %22 : vector<4x256xf32> to vector<1x4x256xf32>
    tpu.vector_store %arg9[%c0_17, %c0_18, %c0_19], %25 {strides = array<i32>} : memref<1x4x256xf32, #tpu.memory_space<vmem>>, vector<1x4x256xf32>,
    return
  }
  func.func @transform_0(%arg0: i32, %arg1: i32) -> (i32, i32, i32) {
    %c0_i32 = arith.constant 0 : i32
    %c0_i32_0 = arith.constant 0 : i32
    return %arg0, %c0_i32, %arg1 : i32, i32, i32
  }
  func.func @transform_1(%arg0: i32, %arg1: i32) -> (i32, i32, i32) {
    %c0_i32 = arith.constant 0 : i32
    %c0_i32_0 = arith.constant 0 : i32
    return %arg0, %c0_i32, %arg1 : i32, i32, i32
  }
  func.func @transform_2(%arg0: i32, %arg1: i32) -> (i32, i32) {
    %c0_i32 = arith.constant 0 : i32
    %c0_i32_0 = arith.constant 0 : i32
    %c0_i32_1 = arith.constant 0 : i32
    return %c0_i32, %c0_i32_0 : i32, i32
  }
  func.func @transform_3(%arg0: i32, %arg1: i32) -> (i32, i32) {
    %c0_i32 = arith.constant 0 : i32
    %c0_i32_0 = arith.constant 0 : i32
    %c0_i32_1 = arith.constant 0 : i32
    return %c0_i32, %c0_i32_0 : i32, i32
  }
  func.func @transform_4(%arg0: i32, %arg1: i32) -> (i32, i32) {
    %c0_i32 = arith.constant 0 : i32
    %c0_i32_0 = arith.constant 0 : i32
    %c0_i32_1 = arith.constant 0 : i32
    return %c0_i32, %c0_i32_0 : i32, i32
  }
  func.func @transform_5(%arg0: i32, %arg1: i32) -> (i32, i32) {
    %c0_i32 = arith.constant 0 : i32
    %c0_i32_0 = arith.constant 0 : i32
    %c0_i32_1 = arith.constant 0 : i32
    return %c0_i32, %c0_i32_0 : i32, i32
  }
  func.func @transform_6(%arg0: i32, %arg1: i32) -> (i32, i32, i32) {
    %c0_i32 = arith.constant 0 : i32
    %c0_i32_0 = arith.constant 0 : i32
    return %arg0, %c0_i32, %arg1 : i32, i32, i32
  }
  func.func @transform_7(%arg0: i32, %arg1: i32) -> (i32, i32, i32) {
    %c0_i32 = arith.constant 0 : i32
    %c0_i32_0 = arith.constant 0 : i32
    return %arg0, %c0_i32, %arg1 : i32, i32, i32
  }
}

</mosaic_0001>

<bundles_post_ra>
// kernel: neg.0
= control target key start
LH: loop header
LB: loop body
LE: loop exit
PB: predicated region body
PF: predicated region fallthrough
CT: control target
= control target key end

     0   :  { %s24_s0 = inlined_call_operand.vmem [shape: f32[4], index: 0, kind: input, shape index: {}]   ;;  %s25_s1 = inlined_call_operand.vmem [shape: f32[4], index: 1, kind: output, shape index: {}]  }
   0x1   :  { %v2_v0 = vld [vmem:[%s24_s0] sm:$0x1] }
   0x2   :  { %v5_v1 = vxor.u32 2147483648, %v2_v0 }
   0x4   :  { %7 = vst [vmem:[%s25_s1] sm:$0x1] %v5_v1 }

// kernel: attention_search.3
= control target key start
LH: loop header
LB: loop body
LE: loop exit
PB: predicated region body
PF: predicated region fallthrough
CT: control target
= control target key end

     0   :  { %s574_s15 = smov 0   ;;  %s576_s16 = smov 0   ;;  %s628_s0 = inlined_call_operand.vmem [shape: f32[2,4,256], index: 0, kind: input, shape index: {}]   ;;  %s629_s1 = inlined_call_operand.vmem [shape: f32[2,4,256], index: 1, kind: input, shape index: {}]   ;;  %s630_s2 = inlined_call_operand.vmem [shape: f32[4,4], index: 2, kind: input, shape index: {}]   ;;  %s631_s3 = inlined_call_operand.vmem [shape: f32[4,4], index: 3, kind: input, shape index: {}]   ;;  %s632_s4 = inlined_call_operand.vmem [shape: f32[2,4,2], index: 4, kind: output, shape index: {}]  }
   0x1   :  { %s578_s17 = smov 0  }
   0x2 LB: > { %s26_s18 = sadd.s32 1, %s542_s16  ;;  %p481_p0 = scmp.ge.s32.totalorder %s546_s17, 1  ;;  %s546_s17 = sphi %s578_s17, %s14_s17   ;;  %s542_s16 = sphi %s576_s16, %s634_s16   ;;  %s538_s15 = sphi %s574_s15, %s633_s15  }
   0x3   : > { %p28_p1 = scmp.ge.s32.totalorder %s26_s18, 2  ;;  %p198_p2 = scmp.lt.s32.totalorder %s546_s17, 3 }
   0x5   : > { %s636_s18 = smov (%p28_p1, %s26_s18), 0  ;;  %p199_p3 = pnand %p481_p0, %p198_p2 }
   0x6   : > { %p237_p4 = scmp.lt.s32.totalorder (!%p199_p3), %s538_s15, 1 }
   0x7   : > { %202 = sbr.rel (%p199_p3) target bundleno = 298 (0x12a), region = 36 }
   0xc   : > { %s638_s15 = smov (!%p237_p4, %s538_s15), 1  ;;  %vm278_vm0 = vcmask 1043456   ;;  %v268_v2 = vld [vmem:[%s631_s3] sm:$0xf]  ;;  %vm274_vm1 = vcmask 31744   ;;  %vm264_vm2 = vcmask 11264  }
   0xd   : > { %s497_s19 = sshll.u32 %s638_s15, 3  ;;  %v266_v5 = vld [vmem:[%s630_s2] sm:$0xf]  ;;  %s486_s30 = sshll.u32 %s638_s15, 2  ;;  %v548_v22 = vmov 0.0   ;;  %vm387_vm3 = vcmask 7168  }
   0xe   : > { %s254_s22 = scalar_lea.vmem %s629_s1, %s497_s19  ;;  %s244_s25 = scalar_lea.vmem %s628_s0, %s497_s19 }
   0xf   : > { %v269_v0 = vld [vmem:[%s254_s22] sm:$0xff]  ;;  %s259_s7 = scalar_lea.vmem %s632_s4, %s486_s30 }
  0x10   : > { %271 = vst [vmem:[#allocation1] ss:$2 sm:$0xff] %v269_v0  ;;  %v267_v1 = vld [vmem:[%s244_s25] sm:$0xff] }
  0x11   : > { %265 = vst.msk [vmem:[%s259_s7] sm:$0xf] %vm264_vm2, %v548_v22 }
  0x17   : > { %v272_v3 = vld.sshfl [vmem:[#allocation1] sm:$0xff pattern:$0x75316420]  ;;  %v273_v4 = vld.sshfl [vmem:[#allocation1 + $0x8] sm:$0xff pattern:$0x75316420] }
  0x18   : > { %324 = vst [vmem:[#allocation1] ss:$2 sm:$0xff] %v267_v1  ;;  %487 = vmatpush.msk.msra.mxu0 %vm278_vm0, %v272_v3  ;;  %489 = vmatpush.msk.msra.mxu1 %vm278_vm0, %v273_v4  ;;  %v374_v24 = vld [vmem:[%s259_s7] sm:$0xf] }
  0x19   : > { %488 = vmatmul.msk.f32.vlgmr.msra.gmra.mxu0 %vm274_vm1, %v268_v2  ;;  %490 = vmatmul.msk.f32.vlgmr.msra.gmra.mxu1 %vm274_vm1, %v268_v2 }
  0x1f   : > { %v325_v6 = vld.sshfl [vmem:[#allocation1] sm:$0xff pattern:$0x75316420]  ;;  %v326_v7 = vld.sshfl [vmem:[#allocation1 + $0x8] sm:$0xff pattern:$0x75316420] }
  0x20   : > { %491 = vmatpush.msk.msra.mxu2 %vm278_vm0, %v325_v6  ;;  %493 = vmatpush.msk.msra.mxu3 %vm278_vm0, %v326_v7 }
  0x21   : > { %492 = vmatmul.msk.f32.vlgmr.msra.gmra.mxu2 %vm274_vm1, %v266_v5  ;;  %494 = vmatmul.msk.f32.vlgmr.msra.gmra.mxu3 %vm274_vm1, %v266_v5 }
  0x96   : > { %v300_v8 = vpop.f32.mrf.mxu0  ;;  %v320_v9 = vpop.f32.mrf.mxu1 }
  0xa4   : > { %v351_v10 = vpop.f32.mrf.mxu2  ;;  %v371_v11 = vpop.f32.mrf.mxu3 }
  0xa5   : > { %v352_v12 = vadd.f32 %v351_v10, %v300_v8  ;;  %v372_v13 = vadd.f32 %v371_v11, %v320_v9 }
  0xa7   : > { %v375_v14 = vsel %vm278_vm0, %v352_v12, 0.0  ;;  %v376_v15 = vsel %vm278_vm0, %v372_v13, 0.0  ;;  %v380_v17 = vmul.f32 %v352_v12, %v352_v12  ;;  %v381_v18 = vmul.f32 %v372_v13, %v372_v13 }
  0xa8   : > { %v377_v16 = vadd.f32 %v376_v15, %v375_v14 }
  0xa9   : > { %v382_v19 = vsel %vm278_vm0, %v380_v17, 0.0  ;;  %v383_v20 = vsel %vm278_vm0, %v381_v18, 0.0 }
  0xaa   : > { %378 = vadd.xlane.f32.xlu0 %v377_v16  ;;  %v384_v21 = vadd.f32 %v383_v20, %v382_v19 }
  0xb2   : > { %385 = vadd.xlane.f32.xlu0 %v384_v21 }
 0x11d   : > { %v379_v23 = vpop.xlane.xlu0 %378 }
 0x125   : > { %v386_v25 = vpop.xlane.xlu0 %385 }
 0x126   : > { %v388_v26 = vsel %vm387_vm3, %v379_v23, %v386_v25 }
 0x127   : > { %v389_v27 = vadd.f32 %v388_v26, %v374_v24 }
 0x129   : > { %391 = vst.msk [vmem:[%s259_s7] sm:$0xf] %vm264_vm2, %v389_v27 }
 0x12a PF: > { %s14_s17 = sadd.s32 1, %s546_s17   ;;  %s633_s15 = smov %s542_s16 }
 0x12b   : > { %p11_p5 = scmp.ge.s32.totalorder %s14_s17, 4   ;;  %s634_s16 = smov %s636_s18 }
 0x12d   :  { %13 = sbr.rel (!%p11_p5) target bundleno = 2 (0x2), region = 73 }

// kernel: attention_search.5
= control target key start
LH: loop header
LB: loop body
LE: loop exit
PB: predicated region body
PF: predicated region fallthrough
CT: control target
= control target key end

     0   :  { %s696_s24 = smov 0   ;;  %s698_s25 = smov 0   ;;  %s747_s0 = inlined_call_operand.vmem [shape: f32[2,4,256], index: 0, kind: input, shape index: {}]   ;;  %s748_s1 = inlined_call_operand.vmem [shape: f32[2,4,256], index: 1, kind: input, shape index: {}]   ;;  %s749_s2 = inlined_call_operand.vmem [shape: f32[4,1], index: 2, kind: input, shape index: {}]   ;;  %s750_s3 = inlined_call_operand.vmem [shape: f32[4,1], index: 3, kind: input, shape index: {}]   ;;  %s751_s4 = inlined_call_operand.vmem [shape: f32[4,1], index: 4, kind: input, shape index: {}]   ;;  %s752_s5 = inlined_call_operand.vmem [shape: f32[4,1], index: 5, kind: input, shape index: {}]   ;;  %s753_s6 = inlined_call_operand.vmem [shape: f32[2,4,256], index: 6, kind: output, shape index: {0}]   ;;  %s754_s7 = inlined_call_operand.vmem [shape: f32[2,4,256], index: 7, kind: output, shape index: {1}]  }
   0x1   :  { %s700_s26 = smov 0  }
   0x2 LB: > { %s30_s27 = sadd.s32 1, %s648_s25  ;;  %p587_p0 = scmp.ge.s32.totalorder %s652_s26, 1  ;;  %s652_s26 = sphi %s700_s26, %s18_s26   ;;  %s648_s25 = sphi %s698_s25, %s756_s25   ;;  %s644_s24 = sphi %s696_s24, %s755_s24  }
   0x3   : > { %p32_p1 = scmp.ge.s32.totalorder %s30_s27, 2  ;;  %p280_p2 = scmp.lt.s32.totalorder %s652_s26, 3 }
   0x5   : > { %s758_s27 = smov (%p32_p1, %s30_s27), 0  ;;  %p281_p3 = pnand %p587_p0, %p280_p2 }
   0x6   : > { %p339_p4 = scmp.lt.s32.totalorder (!%p281_p3), %s644_s24, 1 }
   0x7   : > { %284 = sbr.rel (%p281_p3) target bundleno = 146 (0x92), region = 44 }
   0xc   : > { %v390_v0 = vld [vmem:[%s750_s3] sm:$0xf]  ;;  %v654_v2 = vmov 0   ;;  %s760_s24 = smov (!%p339_p4, %s644_s24), 1  ;;  %v655_v5 = vmov 839922192  }
   0xd   : > { %v379_v1 = vld [vmem:[%s749_s2] sm:$0xf]  ;;  %629 = vset.pattern.permute.xlu1 %v654_v2  ;;  %628 = vset.pattern.permute.xlu0 %v654_v2  ;;  %v385_v6 = vunpack.c.l.s4 %v655_v5  ;;  %s598_s13 = sshll.u32 %s760_s24, 3 }
   0xe   : > { %393 = vperm.xlu1 %629, %v390_v0   ;;  %382 = vperm.xlu0 %628, %v379_v1   ;;  %v415_v3 = vld [vmem:[%s752_s5] sm:$0xf]  ;;  %s346_s16 = scalar_lea.vmem %s747_s0, %s598_s13  ;;  %s356_s19 = scalar_lea.vmem %s748_s1, %s598_s13 }
   0xf   : > { %v404_v4 = vld [vmem:[%s751_s4] sm:$0xf]  ;;  %v386_v7 = vunpack.c.0.s8 %v385_v6  ;;  %s366_s22 = scalar_lea.vmem %s753_s6, %s598_s13  ;;  %s376_s28 = scalar_lea.vmem %s754_s7, %s598_s13 }
  0x10   : > { %v378_v10 = vld [vmem:[%s346_s16] sm:$0xff] }
  0x11   : > { %v403_v18 = vld [vmem:[%s356_s19] sm:$0xff] }
  0x16   : > { %418 = vperm.xlu1 %629, %v415_v3   ;;  %407 = vperm.xlu0 %628, %v404_v4  }
  0x80   : > { %v394_v8 = vpop.permute.xlu1 %393  ;;  %v383_v9 = vpop.permute.xlu0 %382 }
  0x81   : > { %v398_v11 = vperm.slane %v394_v8, %v386_v7  ;;  %v387_v12 = vperm.slane %v383_v9, %v386_v7 }
  0x83   : > { %v389_v13 = vmul.f32 %v387_v12, %v378_v10 }
  0x85   : > { %v400_v14 = vadd.f32 %v398_v11, %v389_v13 }
  0x87   : > { %v401_v15 = vmax.f32 %v400_v14, 0.0 }
  0x88   : > { %v419_v16 = vpop.permute.xlu1 %418  ;;  %v408_v17 = vpop.permute.xlu0 %407 }
  0x89   : > { %402 = vst [vmem:[%s366_s22] sm:$0xff] %v401_v15  ;;  %v412_v19 = vperm.slane %v408_v17, %v386_v7  ;;  %v423_v20 = vperm.slane %v419_v16, %v386_v7 }
  0x8b   : > { %v414_v21 = vmul.f32 %v412_v19, %v403_v18 }
  0x8d   : > { %v425_v22 = vadd.f32 %v423_v20, %v414_v21 }
  0x8f   : > { %v426_v23 = vmax.f32 %v425_v22, 0.0 }
  0x91   : > { %427 = vst [vmem:[%s376_s28] sm:$0xff] %v426_v23 }
  0x92 PF: > { %s18_s26 = sadd.s32 1, %s652_s26   ;;  %s755_s24 = smov %s648_s25 }
  0x93   : > { %p15_p5 = scmp.ge.s32.totalorder %s18_s26, 4   ;;  %s756_s25 = smov %s758_s27 }
  0x95   :  { %17 = sbr.rel (!%p15_p5) target bundleno = 2 (0x2), region = 89 }

// kernel: attention_search.4
= control target key start
LH: loop header
LB: loop body
LE: loop exit
PB: predicated region body
PF: predicated region fallthrough
CT: control target
= control target key end

     0   :  { %s2761_s24 = smov 0   ;;  %s2763_s25 = smov 0   ;;  %s3501_s0 = inlined_call_operand.vmem [shape: f32[2,4,256], index: 0, kind: input, shape index: {}]   ;;  %s3502_s1 = inlined_call_operand.vmem [shape: f32[2,4,256], index: 1, kind: input, shape index: {}]   ;;  %s3503_s2 = inlined_call_operand.vmem [shape: f32[4,4], index: 2, kind: input, shape index: {}]   ;;  %s3504_s3 = inlined_call_operand.vmem [shape: f32[4,4], index: 3, kind: input, shape index: {}]   ;;  %s3505_s4 = inlined_call_operand.vmem [shape: f32[4,4], index: 4, kind: input, shape index: {}]   ;;  %s3506_s5 = inlined_call_operand.vmem [shape: f32[4,1], index: 5, kind: input, shape index: {}]   ;;  %s3507_s6 = inlined_call_operand.vmem [shape: f32[4,4], index: 6, kind: input, shape index: {}]   ;;  %s3508_s7 = inlined_call_operand.vmem [shape: f32[4,4], index: 7, kind: input, shape index: {}]   ;;  %s3509_s8 = inlined_call_operand.vmem [shape: f32[4,4], index: 8, kind: input, shape index: {}]   ;;  %s3510_s9 = inlined_call_operand.vmem [shape: f32[4,4], index: 9, kind: input, shape index: {}]   ;;  %s3511_s10 = inlined_call_operand.vmem [shape: f32[4,1], index: 10, kind: input, shape index: {}]   ;;  %s3512_s11 = inlined_call_operand.vmem [shape: f32[4,4], index: 11, kind: input, shape index: {}]   ;;  %s3513_s12 = inlined_call_operand.vmem [shape: f32[4,4], index: 12, kind: input, shape index: {}]   ;;  %s3514_s13 = inlined_call_operand.vmem [shape: f32[4,1], index: 13, kind: input, shape index: {}]   ;;  %s3515_s14 = inlined_call_operand.vmem [shape: f32[2,4,256], index: 14, kind: output, shape index: {0}]   ;;  %s3516_s15 = inlined_call_operand.vmem [shape: f32[2,4,256], index: 15, kind: output, shape index: {1}]   ;;  %s3517_s16 = inlined_call_operand.vmem [shape: f32[2,4,2], index: 16, kind: output, shape index: {2}]   ;;  %s3518_s17 = inlined_call_operand.vmem [shape: f32[2,4,2], index: 17, kind: output, shape index: {3}]  }
   0x1   :  { %3549 = sst [smem:[#allocation27_spill]] %s3501_s0  ;;  %s2765_s26 = smov 0  }
   0x2   :  { %3550 = sst [smem:[#allocation28_spill]] %s3502_s1 }
   0x3 LB: > { %s40_s27 = sadd.s32 1, %s2663_s25  ;;  %p2317_p0 = scmp.ge.s32.totalorder %s2667_s26, 1  ;;  %s2667_s26 = sphi %s2765_s26, %s28_s26   ;;  %s2663_s25 = sphi %s2763_s25, %s3615_s25   ;;  %s2659_s24 = sphi %s2761_s24, %s3614_s24  }
   0x4   : > { %p42_p1 = scmp.ge.s32.totalorder %s40_s27, 2  ;;  %p520_p2 = scmp.lt.s32.totalorder %s2667_s26, 3 }
   0x6   : > { %s3617_s27 = smov (%p42_p1, %s40_s27), 0  ;;  %p521_p3 = pnand %p2317_p0, %p520_p2 }
   0x8   : > { %524 = sbr.rel (%p521_p3) target bundleno = 1516 (0x5ec), region = 76 }
   0xd   : > { %p598_p4 = scmp.lt.s32.totalorder %s2659_s24, 1  ;;  %s3551_s30 = sld [smem:[#allocation28_spill]]  ;;  %vm656_vm0 = vcmask 1043456   ;;  %v646_v2 = vld [vmem:[%s3504_s3] sm:$0xf]  ;;  %vm652_vm1 = vcmask 31744  }
   0xe   : > { %s3553_s20 = sld [smem:[#allocation27_spill]]  ;;  %v644_v5 = vld [vmem:[%s3503_s2] sm:$0xf]  ;;  %vm982_vm2 = vcmask 1041408   ;;  %v2669_v31 = vmov 0   ;;  %vm902_vm3 = vcmask 27648  }
   0xf   : > { %s3619_s24 = smov (!%p598_p4, %s2659_s24), 1  ;;  %v758_v11 = vld [vmem:[%s3507_s6] sm:$0xf]  ;;  %2512 = vset.pattern.permute.xlu2 %v2669_v31  ;;  %vm641_vm4 = vcmask 11264   ;;  %vm2081_vm5 = vcmask 7168  }
  0x10   : > { %s2782_s28 = sshll.u32 %s3619_s24, 3  ;;  %v935_v15 = vld [vmem:[%s3508_s7] sm:$0xf]  ;;  %s2326_s22 = sshll.u32 %s3619_s24, 2 }
  0x11   : > { %v1000_v30 = vld [vmem:[%s3505_s4] sm:$0xf]  ;;  %s616_s19 = scalar_lea.vmem %s3515_s14, %s2782_s28  ;;  %s631_s29 = scalar_lea.vmem %s3517_s16, %s2326_s22 }
  0x12   : > { %v1001_v46 = vld [vmem:[%s3506_s5] sm:$0xf] }
  0x13   : > { %s607_s18 = scalar_lea.vmem %s3551_s30, %s2782_s28 }
  0x14   : > { %v2788_v0 = vld [vmem:[%s607_s18] sm:$0xff]  ;;  %s602_s21 = scalar_lea.vmem %s3553_s20, %s2782_s28  ;;  %s635_s18 = scalar_lea.vmem %s3518_s17, %s2326_s22 }
  0x15   : > { %3552 = vst [vmem:[#allocation5_spill] sm:$0xff] %v2788_v0  ;;  %v645_v1 = vld [vmem:[%s602_s21] sm:$0xff]  ;;  %s626_s21 = scalar_lea.vmem %s3516_s15, %s2782_s28 }
  0x16   : > { %649 = vst [vmem:[#allocation1] ss:$2 sm:$0xff] %v2788_v0 }
  0x1d   : > { %v650_v3 = vld.sshfl [vmem:[#allocation1] sm:$0xff pattern:$0x75316420]  ;;  %v651_v4 = vld.sshfl [vmem:[#allocation1 + $0x8] sm:$0xff pattern:$0x75316420] }
  0x1e   : > { %2328 = vmatpush.msk.msra.mxu0 %vm656_vm0, %v650_v3  ;;  %702 = vst [vmem:[#allocation1] ss:$2 sm:$0xff] %v645_v1  ;;  %2330 = vmatpush.msk.msra.mxu1 %vm656_vm0, %v651_v4 }
  0x1f   : > { %2329 = vmatmul.msk.f32.vlgmr.msra.gmra.mxu0 %vm652_vm1, %v646_v2  ;;  %2331 = vmatmul.msk.f32.vlgmr.msra.gmra.mxu1 %vm652_vm1, %v646_v2 }
  0x25   : > { %v703_v6 = vld.sshfl [vmem:[#allocation1] sm:$0xff pattern:$0x75316420]  ;;  %v704_v7 = vld.sshfl [vmem:[#allocation1 + $0x8] sm:$0xff pattern:$0x75316420] }
  0x26   : > { %2332 = vmatpush.msk.msrb.mxu0 %vm656_vm0, %v703_v6  ;;  %2334 = vmatpush.msk.msra.mxu3 %vm656_vm0, %v704_v7 }
  0x27   : > { %2333 = vmatmul.msk.f32.vlgmr.msrb.gmra.mxu0 %vm652_vm1, %v644_v5  ;;  %2335 = vmatmul.msk.f32.vlgmr.msra.gmra.mxu3 %vm652_vm1, %v644_v5 }
  0x9c   : > { %v678_v8 = vpop.f32.mrf.mxu0  ;;  %v698_v12 = vpop.f32.mrf.mxu1 }
  0xa4   : > { %v729_v9 = vpop.f32.mrf.mxu0 }
  0xa5   : > { %v730_v10 = vadd.f32 %v729_v9, %v678_v8 }
  0xa7   : > { %2336 = vmatpush.msk.msra.mxu0 %vm656_vm0, %v730_v10 }
  0xa8   : > { %2337 = vmatmul.msk.f32.vlgmr.msra.gmra.mxu0 %vm652_vm1, %v758_v11 }
  0xa9   : > { %2340 = vmatpush.msk.msrb.mxu0 %vm656_vm0, %v730_v10 }
  0xaa   : > { %v749_v13 = vpop.f32.mrf.mxu3 }
  0xab   : > { %v750_v14 = vadd.f32 %v749_v13, %v698_v12 }
  0xad   : > { %v754_v16 = vrot.slane %v750_v14, 4  ;;  %2342 = vmatpush.msk.msrb.mxu3 %vm656_vm0, %v750_v14  ;;  %2338 = vmatpush.msk.msrb.mxu1 %vm656_vm0, %v750_v14 }
  0xae   : > { %2343 = vmatmul.msk.f32.vlgmr.msrb.gmra.mxu3 %vm652_vm1, %v935_v15  ;;  %2339 = vmatmul.msk.f32.vlgmr.msrb.gmra.mxu1 %vm652_vm1, %v758_v11 }
  0xaf   : > { %v755_v17 = vsel %vm656_vm0, %v730_v10, %v754_v16 }
  0xb0   : > { %1008 = vst [vmem:[#allocation1] ss:$2 sm:$0xff] %v755_v17  ;;  %2341 = vmatmul.msk.f32.vlgmr.msrb.gmra.mxu0 %vm652_vm1, %v935_v15 }
  0xb7   : > { %v1009_v18 = vld.sshfl [vmem:[#allocation1] sm:$0xff pattern:$0x75316420]  ;;  %v1010_v19 = vld.sshfl [vmem:[#allocation1 + $0x8] sm:$0xff pattern:$0x75316420] }
  0xb8   : > { %2344 = vmatpush.msk.msra.mxu0 %vm656_vm0, %v1009_v18  ;;  %2346 = vmatpush.msk.msra.mxu1 %vm656_vm0, %v1010_v19 }
  0xb9   : > { %2345 = vmatmul.msk.f32.vlgmr.msra.gmra.mxu0 %vm652_vm1, %v1000_v30  ;;  %2347 = vmatmul.msk.f32.vlgmr.msra.gmra.mxu1 %vm652_vm1, %v1000_v30 }
 0x125   : > { %v783_v20 = vpop.f32.mrf.mxu0 }
 0x126   : > { %806 = vxpose.xlu0.b32.start.end [1/1] (short) %v783_v20, 128 }
 0x12b   : > { %v803_v29 = vpop.f32.mrf.mxu1 }
 0x12c   : > { %838 = vxpose.xlu1.b32.start.end [1/1] (short) %v803_v29, 128 }
 0x12d   : > { %v956_v21 = vpop.f32.mrf.mxu0 }
 0x131   : > { %v976_v22 = vpop.f32.mrf.mxu3 }
 0x132   : > { %v979_v23 = vpack.c.bf16 %v976_v22, %v956_v21 }
 0x134   : > { %v981_v24 = vrot.slane %v979_v23, 2 }
 0x136   : > { %v985_v25 = vsel %vm982_vm2, %v979_v23, %v981_v24  ;;  %v1037_v4 = vpop.f32.mrf.mxu0  ;;  %v1057_v5 = vpop.f32.mrf.mxu1 }
 0x137   : > { %987 = vst [vmem:[#allocation4] sm:$0xf] %v985_v25 }
 0x13e   : > { %v1747_v26 = vld [vmem:[#allocation4] sm:$0xf] }
 0x13f   : > { %1781 = vst [vmem:[#allocation1] ss:$4 sm:$0xff] %v1747_v26 }
 0x146   : > { %v2827_v27 = vld.sshfl [vmem:[#allocation1] sm:$0xff pattern:$0x73625140]  ;;  %v2829_v28 = vld.sshfl [vmem:[#allocation1 + $0x8] sm:$0xff pattern:$0x73625140] }
 0x147   : > { %3554 = vst [vmem:[#allocation6_spill] sm:$0xff] %v2827_v27 }
 0x148   : > { %3555 = vst [vmem:[#allocation7_spill] sm:$0xff] %v2829_v28 }
 0x149   : > { %1894 = vst [vmem:[#allocation1] ss:$2 sm:$0xff] %v645_v1 }
 0x17f   : > { %2511 = vset.pattern.permute.xlu1 %v2669_v31 }
 0x18d   : > { %2510 = vset.pattern.permute.xlu0 %v2669_v31 }
 0x1ca   : > { %v822_v32 = vpop.trf.xlu0 }
 0x1cb   : > { %v870_v33 = vpack.c.bf16 %v822_v32, %v822_v32 }
 0x1cd   : > { %903 = vst.msk [vmem:[#allocation3] sm:$0xf] %vm902_vm3, %v870_v33 }
 0x1d0   : > { %v854_v2 = vpop.trf.xlu1 }
 0x1d1   : > { %v886_v3 = vpack.c.bf16 %v854_v2, %v854_v2 }
 0x1d2   : > { %v823_v34 = vpop.trf.xlu0 }
 0x1d3   : > { %v871_v35 = vpack.c.bf16 %v823_v34, %v823_v34  ;;  %919 = vst.msk [vmem:[#allocation3 + $0x40] sm:$0xf] %vm902_vm3, %v886_v3 }
 0x1d5   : > { %904 = vst.msk [vmem:[#allocation3 + $0x4] sm:$0xf] %vm902_vm3, %v871_v35 }
 0x1d8   : > { %v855_v16 = vpop.trf.xlu1 }
 0x1d9   : > { %v887_v17 = vpack.c.bf16 %v855_v16, %v855_v16 }
 0x1da   : > { %v824_v36 = vpop.trf.xlu0 }
 0x1db   : > { %v872_v37 = vpack.c.bf16 %v824_v36, %v824_v36  ;;  %920 = vst.msk [vmem:[#allocation3 + $0x44] sm:$0xf] %vm902_vm3, %v887_v17 }
 0x1dc   : > { %v2466_v13 = vld [vmem:[#allocation3] sm:$0xff] }
 0x1dd   : > { %905 = vst.msk [vmem:[#allocation3 + $0x8] sm:$0xf] %vm902_vm3, %v872_v37 }
 0x1e0   : > { %v856_v18 = vpop.trf.xlu1 }
 0x1e1   : > { %v888_v19 = vpack.c.bf16 %v856_v18, %v856_v18 }
 0x1e2   : > { %v825_v38 = vpop.trf.xlu0  ;;  %v2474_v34 = vld [vmem:[#allocation3 + $0x40] sm:$0xff] }
 0x1e3   : > { %v873_v39 = vpack.c.bf16 %v825_v38, %v825_v38  ;;  %921 = vst.msk [vmem:[#allocation3 + $0x48] sm:$0xf] %vm902_vm3, %v888_v19 }
 0x1e5   : > { %906 = vst.msk [vmem:[#allocation3 + $0xc] sm:$0xf] %vm902_vm3, %v873_v39 }
 0x1e8   : > { %v857_v22 = vpop.trf.xlu1 }
 0x1e9   : > { %v889_v23 = vpack.c.bf16 %v857_v22, %v857_v22 }
 0x1ea   : > { %v826_v40 = vpop.trf.xlu0 }
 0x1eb   : > { %v874_v41 = vpack.c.bf16 %v826_v40, %v826_v40  ;;  %922 = vst.msk [vmem:[#allocation3 + $0x4c] sm:$0xf] %vm902_vm3, %v889_v23 }
 0x1ec   : > { %v2467_v20 = vld [vmem:[#allocation3 + $0x8] sm:$0xff] }
 0x1ed   : > { %907 = vst.msk [vmem:[#allocation3 + $0x10] sm:$0xf] %vm902_vm3, %v874_v41 }
 0x1f0   : > { %v858_v24 = vpop.trf.xlu1 }
 0x1f1   : > { %v890_v25 = vpack.c.bf16 %v858_v24, %v858_v24 }
 0x1f2   : > { %v827_v42 = vpop.trf.xlu0  ;;  %v2475_v40 = vld [vmem:[#allocation3 + $0x48] sm:$0xff] }
 0x1f3   : > { %v875_v43 = vpack.c.bf16 %v827_v42, %v827_v42  ;;  %923 = vst.msk [vmem:[#allocation3 + $0x50] sm:$0xf] %vm902_vm3, %v890_v25 }
 0x1f5   : > { %908 = vst.msk [vmem:[#allocation3 + $0x14] sm:$0xf] %vm902_vm3, %v875_v43 }
 0x1f8   : > { %v859_v30 = vpop.trf.xlu1 }
 0x1f9   : > { %v891_v31 = vpack.c.bf16 %v859_v30, %v859_v30 }
 0x1fa   : > { %v828_v44 = vpop.trf.xlu0 }
 0x1fb   : > { %v876_v45 = vpack.c.bf16 %v828_v44, %v828_v44  ;;  %924 = vst.msk [vmem:[#allocation3 + $0x54] sm:$0xf] %vm902_vm3, %v891_v31 }
 0x1fc   : > { %v2468_v26 = vld [vmem:[#allocation3 + $0x10] sm:$0xff] }
 0x1fd   : > { %909 = vst.msk [vmem:[#allocation3 + $0x18] sm:$0xf] %vm902_vm3, %v876_v45 }
 0x200   : > { %v860_v32 = vpop.trf.xlu1 }
 0x201   : > { %v892_v33 = vpack.c.bf16 %v860_v32, %v860_v32 }
 0x202   : > { %v829_v47 = vpop.trf.xlu0  ;;  %v2476_v45 = vld [vmem:[#allocation3 + $0x50] sm:$0xff] }
 0x203   : > { %v877_v48 = vpack.c.bf16 %v829_v47, %v829_v47  ;;  %925 = vst.msk [vmem:[#allocation3 + $0x58] sm:$0xf] %vm902_vm3, %v892_v33 }
 0x205   : > { %910 = vst.msk [vmem:[#allocation3 + $0x1c] sm:$0xf] %vm902_vm3, %v877_v48 }
 0x208   : > { %v861_v36 = vpop.trf.xlu1 }
 0x209   : > { %v893_v37 = vpack.c.bf16 %v861_v36, %v861_v36 }
 0x20a   : > { %v830_v49 = vpop.trf.xlu0 }
 0x20b   : > { %v878_v50 = vpack.c.bf16 %v830_v49, %v830_v49  ;;  %926 = vst.msk [vmem:[#allocation3 + $0x5c] sm:$0xf] %vm902_vm3, %v893_v37 }
 0x20c   : > { %1004 = vperm.xlu0 %2510, %v1001_v46   ;;  %v2469_v35 = vld [vmem:[#allocation3 + $0x18] sm:$0xff] }
 0x20d   : > { %911 = vst.msk [vmem:[#allocation3 + $0x20] sm:$0xf] %vm902_vm3, %v878_v50 }
 0x210   : > { %v862_v38 = vpop.trf.xlu1 }
 0x211   : > { %v894_v39 = vpack.c.bf16 %v862_v38, %v862_v38 }
 0x212   : > { %v831_v51 = vpop.trf.xlu0  ;;  %v2477_v50 = vld [vmem:[#allocation3 + $0x58] sm:$0xff] }
 0x213   : > { %v879_v52 = vpack.c.bf16 %v831_v51, %v831_v51  ;;  %927 = vst.msk [vmem:[#allocation3 + $0x60] sm:$0xf] %vm902_vm3, %v894_v39 }
 0x215   : > { %912 = vst.msk [vmem:[#allocation3 + $0x24] sm:$0xf] %vm902_vm3, %v879_v52 }
 0x218   : > { %v863_v41 = vpop.trf.xlu1 }
 0x219   : > { %v895_v42 = vpack.c.bf16 %v863_v41, %v863_v41 }
 0x21a   : > { %v832_v53 = vpop.trf.xlu0 }
 0x21b   : > { %v880_v54 = vpack.c.bf16 %v832_v53, %v832_v53  ;;  %928 = vst.msk [vmem:[#allocation3 + $0x64] sm:$0xf] %vm902_vm3, %v895_v42 }
 0x21c   : > { %v2470_v14 = vld [vmem:[#allocation3 + $0x20] sm:$0xff] }
 0x21d   : > { %913 = vst.msk [vmem:[#allocation3 + $0x28] sm:$0xf] %vm902_vm3, %v880_v54 }
 0x220   : > { %v864_v43 = vpop.trf.xlu1 }
 0x221   : > { %v896_v44 = vpack.c.bf16 %v864_v43, %v864_v43 }
 0x222   : > { %v833_v55 = vpop.trf.xlu0 }
 0x223   : > { %v881_v56 = vpack.c.bf16 %v833_v55, %v833_v55  ;;  %929 = vst.msk [vmem:[#allocation3 + $0x68] sm:$0xf] %vm902_vm3, %v896_v44  ;;  %v2478_v55 = vld [vmem:[#allocation3 + $0x60] sm:$0xff] }
 0x225   : > { %914 = vst.msk [vmem:[#allocation3 + $0x2c] sm:$0xf] %vm902_vm3, %v881_v56 }
 0x228   : > { %v865_v46 = vpop.trf.xlu1 }
 0x229   : > { %v897_v47 = vpack.c.bf16 %v865_v46, %v865_v46 }
 0x22a   : > { %v834_v57 = vpop.trf.xlu0 }
 0x22b   : > { %v882_v58 = vpack.c.bf16 %v834_v57, %v834_v57  ;;  %930 = vst.msk [vmem:[#allocation3 + $0x6c] sm:$0xf] %vm902_vm3, %v897_v47 }
 0x22c   : > { %v2471_v15 = vld [vmem:[#allocation3 + $0x28] sm:$0xff] }
 0x22d   : > { %915 = vst.msk [vmem:[#allocation3 + $0x30] sm:$0xf] %vm902_vm3, %v882_v58 }
 0x230   : > { %v866_v48 = vpop.trf.xlu1 }
 0x231   : > { %v898_v49 = vpack.c.bf16 %v866_v48, %v866_v48 }
 0x232   : > { %v835_v59 = vpop.trf.xlu0  ;;  %v2479_v58 = vld [vmem:[#allocation3 + $0x68] sm:$0xff] }
 0x233   : > { %v883_v60 = vpack.c.bf16 %v835_v59, %v835_v59  ;;  %931 = vst.msk [vmem:[#allocation3 + $0x70] sm:$0xf] %vm902_vm3, %v898_v49 }
 0x235   : > { %916 = vst.msk [vmem:[#allocation3 + $0x34] sm:$0xf] %vm902_vm3, %v883_v60 }
 0x238   : > { %v867_v51 = vpop.trf.xlu1 }
 0x239   : > { %v899_v52 = vpack.c.bf16 %v867_v51, %v867_v51 }
 0x23a   : > { %v836_v61 = vpop.trf.xlu0 }
 0x23b   : > { %v884_v62 = vpack.c.bf16 %v836_v61, %v836_v61  ;;  %932 = vst.msk [vmem:[#allocation3 + $0x74] sm:$0xf] %vm902_vm3, %v899_v52 }
 0x23c   : > { %v2472_v21 = vld [vmem:[#allocation3 + $0x30] sm:$0xff] }
 0x23d   : > { %917 = vst.msk [vmem:[#allocation3 + $0x38] sm:$0xf] %vm902_vm3, %v884_v62 }
 0x240   : > { %v868_v53 = vpop.trf.xlu1 }
 0x241   : > { %v900_v54 = vpack.c.bf16 %v868_v53, %v868_v53 }
 0x242   : > { %v837_v63 = vpop.trf.xlu0 }
 0x243   : > { %v885_v1 = vpack.c.bf16 %v837_v63, %v837_v63  ;;  %933 = vst.msk [vmem:[#allocation3 + $0x78] sm:$0xf] %vm902_vm3, %v900_v54  ;;  %v2480_v63 = vld [vmem:[#allocation3 + $0x70] sm:$0xff] }
 0x245   : > { %918 = vst.msk [vmem:[#allocation3 + $0x3c] sm:$0xf] %vm902_vm3, %v885_v1 }
 0x248   : > { %v869_v56 = vpop.trf.xlu1 }
 0x249   : > { %v901_v57 = vpack.c.bf16 %v869_v56, %v869_v56 }
 0x24b   : > { %934 = vst.msk [vmem:[#allocation3 + $0x7c] sm:$0xf] %vm902_vm3, %v901_v57 }
 0x24c   : > { %v2473_v29 = vld [vmem:[#allocation3 + $0x38] sm:$0xff] }
 0x27e   : > { %v1005_v6 = vpop.permute.xlu0 %1004 }
 0x27f   : > { %v1038_v7 = vadd.f32 %v1037_v4, %v1005_v6  ;;  %v1058_v8 = vadd.f32 %v1057_v5, %v1005_v6  ;;  %v2481_v5 = vld [vmem:[#allocation3 + $0x78] sm:$0xff] }
 0x281   : > { %v1060_v9 = vpack.c.bf16 %v1038_v7, %v1038_v7  ;;  %v1061_v10 = vpack.c.bf16 %v1058_v8, %v1058_v8 }
 0x283   : > { %v1224_v11 = vsel %vm982_vm2, %v1060_v9, 0  ;;  %v1227_v12 = vsel %vm982_vm2, %v1061_v10, 0 }
 0x284   : > { %1236 = vmatpush.bf16.msrb.mxu0 %v1224_v11  ;;  %2482 = vmatpush.bf16.msra.mxu2 %v1224_v11 }
 0x285   : > { %1325 = vmatpush.bf16.msrb.mxu1 %v1227_v12  ;;  %2483 = vmatpush.bf16.msra.mxu3 %v1227_v12 }
 0x287   : > { %2412 = vmatmul.msk.bf16.vlgmr.msrb.gmra.mxu0 %vm652_vm1, %v2466_v13  ;;  %2416 = vmatmul.msk.bf16.vlgmr.msra.gmra.mxu2 %vm652_vm1, %v2470_v14 }
 0x288   : > { %2428 = vmatmul.msk.bf16.vlgmr.msrb.gmra.mxu1 %vm652_vm1, %v2466_v13  ;;  %2433 = vmatmul.msk.bf16.vlgmr.msra.gmra.mxu3 %vm652_vm1, %v2471_v15 }
 0x297   : > { %2413 = vmatmul.msk.bf16.gmra.mxu0 %vm652_vm1, %v2467_v20  ;;  %2417 = vmatmul.msk.bf16.gmra.mxu2 %vm652_vm1, %v2471_v15 }
 0x298   : > { %2429 = vmatmul.msk.bf16.gmra.mxu1 %vm652_vm1, %v2467_v20  ;;  %2434 = vmatmul.msk.bf16.gmra.mxu3 %vm652_vm1, %v2472_v21 }
 0x2a7   : > { %2414 = vmatmul.msk.bf16.gmra.mxu0 %vm652_vm1, %v2468_v26  ;;  %2418 = vmatmul.msk.bf16.gmra.mxu2 %vm652_vm1, %v2472_v21 }
 0x2a8   : > { %2430 = vmatmul.msk.bf16.gmra.mxu1 %vm652_vm1, %v2468_v26  ;;  %2435 = vmatmul.msk.bf16.gmra.mxu3 %vm652_vm1, %v2473_v29 }
 0x2b7   : > { %2415 = vmatmul.msk.bf16.gmra.mxu0 %vm652_vm1, %v2469_v35  ;;  %2419 = vmatmul.msk.bf16.gmra.mxu2 %vm652_vm1, %v2473_v29 }
 0x2b8   : > { %2431 = vmatmul.msk.bf16.gmra.mxu1 %vm652_vm1, %v2469_v35  ;;  %2436 = vmatmul.msk.bf16.gmra.mxu3 %vm652_vm1, %v2474_v34 }
 0x2c7   : > { %2420 = vmatmul.msk.bf16.gmra.mxu2 %vm652_vm1, %v2474_v34 }
 0x2c8   : > { %2432 = vmatmul.msk.bf16.gmra.mxu1 %vm652_vm1, %v2470_v14  ;;  %2437 = vmatmul.msk.bf16.gmra.mxu3 %vm652_vm1, %v2475_v40 }
 0x2d7   : > { %2421 = vmatmul.msk.bf16.gmra.mxu2 %vm652_vm1, %v2475_v40 }
 0x2d8   : > { %2438 = vmatmul.msk.bf16.gmra.mxu3 %vm652_vm1, %v2476_v45 }
 0x2e7   : > { %2422 = vmatmul.msk.bf16.gmra.mxu2 %vm652_vm1, %v2476_v45 }
 0x2e8   : > { %2439 = vmatmul.msk.bf16.gmra.mxu3 %vm652_vm1, %v2477_v50 }
 0x2f7   : > { %2423 = vmatmul.msk.bf16.gmra.mxu2 %vm652_vm1, %v2477_v50 }
 0x2f8   : > { %2440 = vmatmul.msk.bf16.gmra.mxu3 %vm652_vm1, %v2478_v55 }
 0x304   : > { %v2965_v30 = vpop.f32.mrf.mxu0 }
 0x305   : > { %v2928_v10 = vpop.f32.mrf.mxu1 }
 0x307   : > { %2424 = vmatmul.msk.bf16.gmra.mxu2 %vm652_vm1, %v2478_v55 }
 0x308   : > { %2441 = vmatmul.msk.bf16.gmra.mxu3 %vm652_vm1, %v2479_v58 }
 0x30a   : > { %v2900_v59 = vpop.f32.mrf.mxu2 }
 0x30b   : > { %v2902_v60 = vpop.f32.mrf.mxu3 }
 0x30c   : > { %v2977_v36 = vpop.f32.mrf.mxu0 }
 0x30d   : > { %v2935_v13 = vpop.f32.mrf.mxu1  ;;  %3561 = vst [vmem:[#allocation13_spill] sm:$0xff] %v2977_v36 }
 0x312   : > { %v2904_v61 = vpop.f32.mrf.mxu2 }
 0x313   : > { %v2906_v62 = vpop.f32.mrf.mxu3 }
 0x314   : > { %3556 = vst [vmem:[#allocation8_spill] sm:$0xff] %v2906_v62  ;;  %v2985_v40 = vpop.f32.mrf.mxu0 }
 0x315   : > { %v2943_v17 = vpop.f32.mrf.mxu1  ;;  %3562 = vst [vmem:[#allocation14_spill] sm:$0xff] %v2985_v40 }
 0x316   : > { %v1444_v47 = vmax.f32 %v2928_v10, %v2943_v17 }
 0x317   : > { %2425 = vmatmul.msk.bf16.gmra.mxu2 %vm652_vm1, %v2479_v58 }
 0x318   : > { %2442 = vmatmul.msk.bf16.gmra.mxu3 %vm652_vm1, %v2480_v63 }
 0x31a   : > { %v2910_v1 = vpop.f32.mrf.mxu2 }
 0x31b   : > { %v2912_v2 = vpop.f32.mrf.mxu3 }
 0x31c   : > { %3557 = vst [vmem:[#allocation9_spill] sm:$0xff] %v2912_v2  ;;  %v2993_v44 = vpop.f32.mrf.mxu0 }
 0x31d   : > { %v2951_v21 = vpop.f32.mrf.mxu1  ;;  %3564 = vst [vmem:[#allocation16_spill] sm:$0xff] %v2993_v44 }
 0x31e   : > { %v1445_v48 = vmax.f32 %v2935_v13, %v2951_v21 }
 0x322   : > { %v2914_v3 = vpop.f32.mrf.mxu2 }
 0x323   : > { %v2916_v4 = vpop.f32.mrf.mxu3 }
 0x324   : > { %v3007_v52 = vpop.f32.mrf.mxu0 }
 0x325   : > { %v2957_v24 = vpop.f32.mrf.mxu1  ;;  %3565 = vst [vmem:[#allocation17_spill] sm:$0xff] %v3007_v52 }
 0x326   : > { %v1446_v49 = vmax.f32 %v1444_v47, %v2957_v24 }
 0x327   : > { %2426 = vmatmul.msk.bf16.gmra.mxu2 %vm652_vm1, %v2480_v63 }
 0x328   : > { %2443 = vmatmul.msk.bf16.gmra.mxu3 %vm652_vm1, %v2481_v5 }
 0x32a   : > { %v2920_v6 = vpop.f32.mrf.mxu2 }
 0x32b   : > { %v2922_v7 = vpop.f32.mrf.mxu3 }
 0x32c   : > { %3558 = vst [vmem:[#allocation10_spill] sm:$0xff] %v2922_v7 }
 0x32d   : > { %v2963_v29 = vpop.f32.mrf.mxu1 }
 0x32e   : > { %v1447_v50 = vmax.f32 %v1445_v48, %v2963_v29  ;;  %v3021_v48 = vpop.f32.mrf.mxu0 }
 0x32f   : > { %3567 = vst [vmem:[#allocation19_spill] sm:$0xff] %v3021_v48 }
 0x332   : > { %v2924_v8 = vpop.f32.mrf.mxu2 }
 0x333   : > { %v2926_v9 = vpop.f32.mrf.mxu3 }
 0x335   : > { %v2973_v34 = vpop.f32.mrf.mxu1 }
 0x336   : > { %v1448_v53 = vmax.f32 %v1446_v49, %v2973_v34  ;;  %v3033_v27 = vpop.f32.mrf.mxu0 }
 0x337   : > { %2427 = vmatmul.msk.bf16.gmra.mxu2 %vm652_vm1, %v2481_v5 }
 0x33a   : > { %v2931_v11 = vpop.f32.mrf.mxu2 }
 0x33b   : > { %v2933_v12 = vpop.f32.mrf.mxu3 }
 0x33d   : > { %v2983_v39 = vpop.f32.mrf.mxu1 }
 0x33e   : > { %v1449_v54 = vmax.f32 %v1447_v50, %v2983_v39 }
 0x342   : > { %v2937_v14 = vpop.f32.mrf.mxu2 }
 0x343   : > { %v2939_v15 = vpop.f32.mrf.mxu3 }
 0x344   : > { %3559 = vst [vmem:[#allocation11_spill] sm:$0xff] %v2939_v15 }
 0x345   : > { %v2991_v43 = vpop.f32.mrf.mxu1 }
 0x346   : > { %v1450_v56 = vmax.f32 %v1448_v53, %v2991_v43 }
 0x348   : > { %v1452_v63 = vmax.f32 %v1450_v56, %v2902_v60 }
 0x34a   : > { %v2941_v16 = vpop.f32.mrf.mxu2  ;;  %v1454_v49 = vmax.f32 %v1452_v63, %v2912_v2 }
 0x34b   : > { %v2945_v18 = vpop.f32.mrf.mxu3 }
 0x34c   : > { %v1456_v53 = vmax.f32 %v1454_v49, %v2922_v7 }
 0x34d   : > { %v3005_v51 = vpop.f32.mrf.mxu1 }
 0x34e   : > { %v1451_v57 = vmax.f32 %v1449_v54, %v3005_v51  ;;  %v1458_v56 = vmax.f32 %v1456_v53, %v2933_v12 }
 0x350   : > { %v1453_v5 = vmax.f32 %v1451_v57, %v2906_v62  ;;  %v1460_v62 = vmax.f32 %v1458_v56, %v2945_v18  ;;  %v1408_v56 = vmax.f32 %v2977_v36, %v2993_v44 }
 0x352   : > { %v2947_v19 = vpop.f32.mrf.mxu2  ;;  %v1455_v50 = vmax.f32 %v1453_v5, %v2916_v4 }
 0x353   : > { %v2949_v20 = vpop.f32.mrf.mxu3 }
 0x354   : > { %3560 = vst [vmem:[#allocation12_spill] sm:$0xff] %v2949_v20  ;;  %v1457_v54 = vmax.f32 %v1455_v50, %v2926_v9 }
 0x356   : > { %v1459_v57 = vmax.f32 %v1457_v54, %v2939_v15 }
 0x358   : > { %v1461_v63 = vmax.f32 %v1459_v57, %v2949_v20  ;;  %v1407_v57 = vmax.f32 %v2965_v30, %v2985_v40  ;;  %v3051_v20 = vpop.f32.mrf.mxu0 }
 0x359   : > { %3569 = vst [vmem:[#allocation21_spill] sm:$0xff] %v3051_v20 }
 0x35a   : > { %v2953_v22 = vpop.f32.mrf.mxu2 }
 0x35b   : > { %v2955_v23 = vpop.f32.mrf.mxu3 }
 0x35c   : > { %v1462_v5 = vmax.f32 %v1460_v62, %v2955_v23 }
 0x362   : > { %v2959_v25 = vpop.f32.mrf.mxu2 }
 0x363   : > { %v2961_v26 = vpop.f32.mrf.mxu3 }
 0x364   : > { %v1463_v49 = vmax.f32 %v1461_v63, %v2961_v26 }
 0x36a   : > { %v2967_v31 = vpop.f32.mrf.mxu2 }
 0x36b   : > { %v2969_v32 = vpop.f32.mrf.mxu3 }
 0x36c   : > { %v1464_v50 = vmax.f32 %v1462_v5, %v2969_v32  ;;  %v1410_v5 = vmax.f32 %v1408_v56, %v3021_v48 }
 0x36e   : > { %v1412_v44 = vmax.f32 %v1410_v5, %v3051_v20 }
 0x370   : > { %v1414_v56 = vmax.f32 %v1412_v44, %v2904_v61 }
 0x372   : > { %v2971_v33 = vpop.f32.mrf.mxu2 }
 0x373   : > { %v2975_v35 = vpop.f32.mrf.mxu3 }
 0x374   : > { %v1465_v53 = vmax.f32 %v1463_v49, %v2975_v35  ;;  %v1409_v49 = vmax.f32 %v1407_v57, %v3007_v52 }
 0x376   : > { %v1411_v40 = vmax.f32 %v1409_v49, %v3033_v27 }
 0x378   : > { %v1413_v57 = vmax.f32 %v1411_v40, %v2900_v59 }
 0x37a   : > { %v2979_v37 = vpop.f32.mrf.mxu2  ;;  %v1415_v52 = vmax.f32 %v1413_v57, %v2910_v1 }
 0x37b   : > { %v2981_v38 = vpop.f32.mrf.mxu3 }
 0x37c   : > { %v1466_v54 = vmax.f32 %v1464_v50, %v2981_v38 }
 0x382   : > { %v2987_v41 = vpop.f32.mrf.mxu2 }
 0x383   : > { %v2989_v42 = vpop.f32.mrf.mxu3 }
 0x384   : > { %3563 = vst [vmem:[#allocation15_spill] sm:$0xff] %v2989_v42  ;;  %v1467_v15 = vmax.f32 %v1465_v53, %v2989_v42 }
 0x38a   : > { %v2995_v45 = vpop.f32.mrf.mxu2 }
 0x38b   : > { %v2997_v46 = vpop.f32.mrf.mxu3 }
 0x38c   : > { %v1468_v62 = vmax.f32 %v1466_v54, %v2997_v46 }
 0x392   : > { %v3015_v58 = vpop.f32.mrf.mxu2 }
 0x393   : > { %v3011_v55 = vpop.f32.mrf.mxu3 }
 0x394   : > { %3566 = vst [vmem:[#allocation18_spill] sm:$0xff] %v3011_v55  ;;  %v1469_v63 = vmax.f32 %v1467_v15, %v3011_v55 }
 0x39a   : > { %v3025_v0 = vpop.f32.mrf.mxu2 }
 0x39b   : > { %v3019_v47 = vpop.f32.mrf.mxu3 }
 0x39c   : > { %v1470_v50 = vmax.f32 %v1468_v62, %v3019_v47 }
 0x3a2   : > { %v3037_v2 = vpop.f32.mrf.mxu2 }
 0x3a3   : > { %v3029_v28 = vpop.f32.mrf.mxu3 }
 0x3a4   : > { %3568 = vst [vmem:[#allocation20_spill] sm:$0xff] %v3029_v28  ;;  %v1471_v53 = vmax.f32 %v1469_v63, %v3029_v28  ;;  %v1416_v63 = vmax.f32 %v1414_v56, %v2914_v3 }
 0x3a6   : > { %v1418_v49 = vmax.f32 %v1416_v63, %v2924_v8 }
 0x3aa   : > { %v3059_v42 = vpop.f32.mrf.mxu2 }
 0x3ab   : > { %v3041_v7 = vpop.f32.mrf.mxu3 }
 0x3ac   : > { %v1472_v54 = vmax.f32 %v1470_v50, %v3041_v7  ;;  %v1417_v50 = vmax.f32 %v1415_v52, %v2920_v6 }
 0x3ae   : > { %v1419_v44 = vmax.f32 %v1417_v50, %v2931_v11 }
 0x3b2   : > { %v3071_v5 = vpop.f32.mrf.mxu2 }
 0x3b3   : > { %v3062_v36 = vpop.f32.mrf.mxu3 }
 0x3b4   : > { %v1473_v15 = vmax.f32 %v1471_v53, %v3062_v36 }
 0x3b6   : > { %v1474_v55 = vmax.f32 %v1472_v54, %v1473_v15  ;;  %v1420_v54 = vmax.f32 %v1418_v49, %v2937_v14  ;;  %v1421_v15 = vmax.f32 %v1419_v44, %v2941_v16 }
 0x3b8   : > { %v1475_v62 = vrot.slane %v1474_v55, 4 }
 0x3ba   : > { %v1476_v48 = vmax.f32 %v1474_v55, %v1475_v62  ;;  %v1422_v55 = vmax.f32 %v1420_v54, %v2947_v19  ;;  %v3081_v56 = vpop.f32.mrf.mxu2 }
 0x3bc   : > { %v1477_v20 = vrot.slane %v1476_v48, 2  ;;  %v1424_v57 = vmax.f32 %v1422_v55, %v2959_v25 }
 0x3be   : > { %v1478_v28 = vmax.f32 %v1476_v48, %v1477_v20  ;;  %v1423_v20 = vmax.f32 %v1421_v15, %v2953_v22  ;;  %v1426_v62 = vmax.f32 %v1424_v57, %v2971_v33 }
 0x3c0   : > { %v1479_v53 = vrot.slane %v1478_v28, 1  ;;  %v1425_v63 = vmax.f32 %v1423_v20, %v2967_v31  ;;  %v1428_v49 = vmax.f32 %v1426_v62, %v2987_v41 }
 0x3c2   : > { %v3077_v40 = vmax.f32 %v1478_v28, %v1479_v53  ;;  %v1427_v53 = vmax.f32 %v1425_v63, %v2979_v37 }
 0x3c4   : > { %v1482_v52 = vsub.f32 %v2928_v10, %v3077_v40  ;;  %v1484_v48 = vsub.f32 %v2935_v13, %v3077_v40  ;;  %v1486_v28 = vsub.f32 %v2943_v17, %v3077_v40  ;;  %v1488_v50 = vsub.f32 %v2951_v21, %v3077_v40 }
 0x3c5   : > { %v1430_v10 = vmax.f32 %v1428_v49, %v3015_v58  ;;  %v1490_v13 = vsub.f32 %v2957_v24, %v3077_v40  ;;  %v1429_v15 = vmax.f32 %v1427_v53, %v2995_v45  ;;  %v1492_v57 = vsub.f32 %v2963_v29, %v3077_v40 }
 0x3c6   : > { %v1547_v54 = vmul.f32 1.442695, %v1482_v52  ;;  %v1551_v44 = vmul.f32 1.442695, %v1484_v48  ;;  %v1555_v55 = vmul.f32 1.442695, %v1486_v28  ;;  %v3105_v52 = vpop.f32.mrf.mxu2  ;;  %v1494_v24 = vsub.f32 %v2973_v34, %v3077_v40 }
 0x3c7   : > { %v1432_v17 = vmax.f32 %v1430_v10, %v3037_v2  ;;  %v1559_v21 = vmul.f32 1.442695, %v1488_v50  ;;  %v1431_v20 = vmax.f32 %v1429_v15, %v3025_v0  ;;  %v1563_v62 = vmul.f32 1.442695, %v1490_v13 }
 0x3c8   : > { %2513 = vpow2.f32 %v1547_v54  ;;  %v1496_v63 = vsub.f32 %v2983_v39, %v3077_v40  ;;  %v1567_v29 = vmul.f32 1.442695, %v1492_v57  ;;  %v1498_v54 = vsub.f32 %v2991_v43, %v3077_v40 }
 0x3c9   : > { %2515 = vpow2.f32 %v1551_v44  ;;  %v1434_v48 = vmax.f32 %v1432_v17, %v3071_v5  ;;  %v1433_v28 = vmax.f32 %v1431_v20, %v3059_v42  ;;  %v1571_v34 = vmul.f32 1.442695, %v1494_v24 }
 0x3ca   : > { %2517 = vpow2.f32 %v1555_v55  ;;  %v1500_v39 = vsub.f32 %v3005_v51, %v3077_v40  ;;  %v1575_v55 = vmul.f32 1.442695, %v1496_v63  ;;  %v1502_v43 = vsub.f32 %v2902_v60, %v3077_v40 }
 0x3cb   : > { %2519 = vpow2.f32 %v1559_v21  ;;  %v1436_v49 = vmax.f32 %v1434_v48, %v3105_v52  ;;  %v1435_v44 = vmax.f32 %v1433_v28, %v3081_v56  ;;  %v1579_v21 = vmul.f32 1.442695, %v1498_v54 }
 0x3cc   : > { %2521 = vpow2.f32 %v1563_v62  ;;  %v3575_v62 = vld [vmem:[#allocation8_spill] sm:$0xff]  ;;  %v1583_v28 = vmul.f32 1.442695, %v1500_v39  ;;  %v1587_v54 = vmul.f32 1.442695, %v1502_v43  ;;  %v1512_v43 = vsub.f32 %v2926_v9, %v3077_v40 }
 0x3cd   : > { %2523 = vpow2.f32 %v1567_v29  ;;  %v1437_v15 = vmax.f32 %v1435_v44, %v1436_v49  ;;  %v1504_v51 = vsub.f32 %v3575_v62, %v3077_v40  ;;  %v3577_v44 = vld [vmem:[#allocation9_spill] sm:$0xff]  ;;  %v1508_v62 = vsub.f32 %v2916_v4, %v3077_v40 }
 0x3ce   : > { %v3114_v50 = vpop.eup %2513  ;;  %2525 = vpow2.f32 %v1571_v34  ;;  %v1506_v60 = vsub.f32 %v3577_v44, %v3077_v40 }
 0x3cf   : > { %3570 = vst [vmem:[#allocation22_spill] sm:$0xff] %v3114_v50  ;;  %v3116_v53 = vpop.eup %2515  ;;  %v1438_v20 = vrot.slane %v1437_v15, 4  ;;  %2527 = vpow2.f32 %v1575_v55  ;;  %v1591_v39 = vmul.f32 1.442695, %v1504_v51  ;;  %v3578_v55 = vld [vmem:[#allocation10_spill] sm:$0xff]  ;;  %v3580_v51 = vld [vmem:[#allocation11_spill] sm:$0xff] }
 0x3d0   : > { %3571 = vst [vmem:[#allocation23_spill] sm:$0xff] %v3116_v53  ;;  %v1710_v10 = vadd.f32 %v3116_v53, %v3114_v50  ;;  %v3123_v13 = vpop.eup %2517  ;;  %2529 = vpow2.f32 %v1579_v21  ;;  %v1595_v21 = vmul.f32 1.442695, %v1506_v60  ;;  %v1516_v44 = vsub.f32 %v3580_v51, %v3077_v40 }
 0x3d1   : > { %3572 = vst [vmem:[#allocation24_spill] sm:$0xff] %v3123_v13  ;;  %v3128_v57 = vpop.eup %2519  ;;  %v1439_v63 = vmax.f32 %v1437_v15, %v1438_v20  ;;  %2531 = vpow2.f32 %v1583_v28  ;;  %v1510_v15 = vsub.f32 %v3578_v55, %v3077_v40  ;;  %v1522_v50 = vsub.f32 %v2955_v23, %v3077_v40 }
 0x3d2   : > { %v1711_v17 = vadd.f32 %v3123_v13, %v1710_v10  ;;  %3573 = vst [vmem:[#allocation25_spill] sm:$0xff] %v3128_v57  ;;  %v3133_v24 = vpop.eup %2521  ;;  %2533 = vpow2.f32 %v1587_v54 }
 0x3d3   : > { %3574 = vst [vmem:[#allocation26_spill] sm:$0xff] %v3133_v24  ;;  %v3138_v49 = vpop.eup %2523  ;;  %v1440_v34 = vrot.slane %v1439_v63, 2  ;;  %2535 = vpow2.f32 %v1591_v39 }
 0x3d4   : > { %v1712_v48 = vadd.f32 %v3128_v57, %v1711_v17  ;;  %3576 = vst [vmem:[#allocation8_spill] sm:$0xff] %v3138_v49  ;;  %v3143_v17 = vpop.eup %2525  ;;  %2537 = vpow2.f32 %v1595_v21 }
 0x3d5   : > { %v3150_v53 = vpop.eup %2527 }
 0x3d6   : > { %v1713_v29 = vadd.f32 %v3133_v24, %v1712_v48  ;;  %v1441_v48 = vmax.f32 %v1439_v63, %v1440_v34  ;;  %3579 = vst [vmem:[#allocation9_spill] sm:$0xff] %v3150_v53  ;;  %v3157_v28 = vpop.eup %2529  ;;  %v1518_v63 = vsub.f32 %v2945_v18, %v3077_v40  ;;  %v1603_v34 = vmul.f32 1.442695, %v1510_v15 }
 0x3d7   : > { %v3164_v60 = vpop.eup %2531  ;;  %v1524_v18 = vsub.f32 %v2961_v26, %v3077_v40  ;;  %v1526_v15 = vsub.f32 %v2969_v32, %v3077_v40  ;;  %v1530_v26 = vsub.f32 %v2981_v38, %v3077_v40  ;;  %v1627_v32 = vmul.f32 1.442695, %v1522_v50 }
 0x3d8   : > { %v1714_v10 = vadd.f32 %v3138_v49, %v1713_v29  ;;  %v1514_v29 = vsub.f32 %v2933_v12, %v3077_v40  ;;  %v1442_v54 = vrot.slane %v1441_v48, 1  ;;  %v3581_v12 = vld [vmem:[#allocation12_spill] sm:$0xff]  ;;  %v3171_v39 = vpop.eup %2533 }
 0x3d9   : > { %v1520_v55 = vsub.f32 %v3581_v12, %v3077_v40  ;;  %v1619_v12 = vmul.f32 1.442695, %v1518_v63  ;;  %v3180_v23 = vpop.eup %2535  ;;  %v1631_v63 = vmul.f32 1.442695, %v1524_v18  ;;  %v1534_v18 = vsub.f32 %v2997_v46, %v3077_v40 }
 0x3da   : > { %v1715_v20 = vadd.f32 %v3143_v17, %v1714_v10  ;;  %v1599_v10 = vmul.f32 1.442695, %v1508_v62  ;;  %v1611_v51 = vmul.f32 1.442695, %v1514_v29  ;;  %v3178_v21 = vmax.f32 %v1441_v48, %v1442_v54 }
 0x3db   : > { %v1528_v29 = vsub.f32 %v2975_v35, %v3077_v40  ;;  %v1635_v48 = vmul.f32 1.442695, %v1526_v15  ;;  %v1643_v15 = vmul.f32 1.442695, %v1530_v26  ;;  %v1538_v26 = vsub.f32 %v3019_v47, %v3077_v40 }
 0x3dc   : > { %v1716_v4 = vadd.f32 %v3150_v53, %v1715_v20  ;;  %v1607_v20 = vmul.f32 1.442695, %v1512_v43  ;;  %2539 = vpow2.f32 %v1599_v10  ;;  %v3187_v10 = vpop.eup %2537  ;;  %v1481_v35 = vsub.f32 %v2965_v30, %v3178_v21 }
 0x3dd   : > { %2541 = vpow2.f32 %v1603_v34  ;;  %v1639_v50 = vmul.f32 1.442695, %v1528_v29 }
 0x3de   : > { %v1717_v9 = vadd.f32 %v3157_v28, %v1716_v4  ;;  %v1615_v4 = vmul.f32 1.442695, %v1516_v44  ;;  %2543 = vpow2.f32 %v1607_v20  ;;  %v3583_v20 = vld [vmem:[#allocation13_spill] sm:$0xff] }
 0x3df   : > { %2545 = vpow2.f32 %v1611_v51  ;;  %v1483_v51 = vsub.f32 %v3583_v20, %v3178_v21  ;;  %v1545_v20 = vmul.f32 1.442695, %v1481_v35  ;;  %v3591_v35 = vld [vmem:[#allocation20_spill] sm:$0xff] }
 0x3e0   : > { %v1718_v62 = vadd.f32 %v3164_v60, %v1717_v9  ;;  %v1623_v9 = vmul.f32 1.442695, %v1520_v55  ;;  %2547 = vpow2.f32 %v1615_v4  ;;  %v3582_v55 = vld [vmem:[#allocation15_spill] sm:$0xff] }
 0x3e1   : > { %2549 = vpow2.f32 %v1619_v12  ;;  %v1532_v38 = vsub.f32 %v3582_v55, %v3077_v40  ;;  %v3584_v12 = vld [vmem:[#allocation18_spill] sm:$0xff] }
 0x3e2   : > { %v1719_v43 = vadd.f32 %v3171_v39, %v1718_v62  ;;  %v3192_v54 = vpop.eup %2539  ;;  %2551 = vpow2.f32 %v1623_v9 }
 0x3e3   : > { %v3198_v62 = vpop.eup %2541  ;;  %2553 = vpow2.f32 %v1627_v32  ;;  %v1647_v32 = vmul.f32 1.442695, %v1532_v38 }
 0x3e4   : > { %v1720_v44 = vadd.f32 %v3180_v23, %v1719_v43  ;;  %v3203_v30 = vpop.eup %2543  ;;  %v1536_v43 = vsub.f32 %v3584_v12, %v3077_v40  ;;  %2555 = vpow2.f32 %v1631_v63  ;;  %v1651_v63 = vmul.f32 1.442695, %v1534_v18 }
 0x3e5   : > { %v3207_v9 = vpop.eup %2545  ;;  %2557 = vpow2.f32 %v1635_v48 }
 0x3e6   : > { %v1721_v34 = vadd.f32 %v3187_v10, %v1720_v44  ;;  %3585 = vst [vmem:[#allocation10_spill] sm:$0xff] %v3207_v9  ;;  %v3586_v44 = vld [vmem:[#allocation14_spill] sm:$0xff]  ;;  %v3212_v46 = vpop.eup %2547  ;;  %2559 = vpow2.f32 %v1639_v50  ;;  %v1655_v49 = vmul.f32 1.442695, %v1536_v43  ;;  %v3593_v50 = vld [vmem:[#allocation17_spill] sm:$0xff] }
 0x3e7   : > { %v1485_v55 = vsub.f32 %v3586_v44, %v3178_v21  ;;  %3587 = vst [vmem:[#allocation11_spill] sm:$0xff] %v3212_v46  ;;  %v3216_v57 = vpop.eup %2549  ;;  %2561 = vpow2.f32 %v1643_v15  ;;  %v1540_v44 = vsub.f32 %v3591_v35, %v3077_v40 }
 0x3e8   : > { %v1722_v4 = vadd.f32 %v3192_v54, %v1721_v34  ;;  %v1549_v34 = vmul.f32 1.442695, %v1483_v51  ;;  %3588 = vst [vmem:[#allocation12_spill] sm:$0xff] %v3216_v57  ;;  %v3221_v13 = vpop.eup %2551  ;;  %2563 = vpow2.f32 %v1545_v20  ;;  %v1489_v51 = vsub.f32 %v3593_v50, %v3178_v21 }
 0x3e9   : > { %3590 = vst [vmem:[#allocation15_spill] sm:$0xff] %v3221_v13  ;;  %v3225_v47 = vpop.eup %2553  ;;  %v1553_v18 = vmul.f32 1.442695, %v1485_v55  ;;  %v1493_v20 = vsub.f32 %v3033_v27, %v3178_v21  ;;  %v1663_v55 = vmul.f32 1.442695, %v1540_v44  ;;  %v1511_v27 = vsub.f32 %v2937_v14, %v3178_v21 }
 0x3ea   : > { %v1723_v29 = vadd.f32 %v3198_v62, %v1722_v4  ;;  %v3589_v4 = vld [vmem:[#allocation16_spill] sm:$0xff]  ;;  %3592 = vst [vmem:[#allocation13_spill] sm:$0xff] %v3225_v47  ;;  %2565 = vpow2.f32 %v1549_v34  ;;  %v3230_v15 = vpop.eup %2555  ;;  %v3596_v34 = vld [vmem:[#allocation21_spill] sm:$0xff] }
 0x3eb   : > { %v1487_v12 = vsub.f32 %v3589_v4, %v3178_v21  ;;  %3594 = vst [vmem:[#allocation18_spill] sm:$0xff] %v3230_v15  ;;  %2567 = vpow2.f32 %v1647_v32  ;;  %v3595_v4 = vld [vmem:[#allocation19_spill] sm:$0xff]  ;;  %v3234_v53 = vpop.eup %2557  ;;  %v1495_v32 = vsub.f32 %v3596_v34, %v3178_v21  ;;  %v1505_v34 = vsub.f32 %v2920_v6, %v3178_v21 }
 0x3ec   : > { %v1724_v48 = vadd.f32 %v3203_v30, %v1723_v29  ;;  %v1659_v29 = vmul.f32 1.442695, %v1538_v26  ;;  %v1491_v24 = vsub.f32 %v3595_v4, %v3178_v21  ;;  %2569 = vpow2.f32 %v1651_v63  ;;  %v3239_v35 = vpop.eup %2559 }
 0x3ed   : > { %2571 = vpow2.f32 %v1655_v49  ;;  %v3243_v26 = vpop.eup %2561  ;;  %v1509_v63 = vsub.f32 %v2931_v11, %v3178_v21  ;;  %v1507_v11 = vsub.f32 %v2924_v8, %v3178_v21  ;;  %v1499_v6 = vsub.f32 %v2904_v61, %v3178_v21 }
 0x3ee   : > { %v1725_v38 = vadd.f32 %v3207_v9, %v1724_v48  ;;  %v1557_v48 = vmul.f32 1.442695, %v1487_v12  ;;  %2573 = vpow2.f32 %v1553_v18  ;;  %v3248_v4 = vpop.eup %2563  ;;  %v1565_v49 = vmul.f32 1.442695, %v1491_v24 }
 0x3ef   : > { %2575 = vpow2.f32 %v1659_v29  ;;  %v1497_v24 = vsub.f32 %v2900_v59, %v3178_v21  ;;  %v1601_v29 = vmul.f32 1.442695, %v1509_v63  ;;  %v1593_v59 = vmul.f32 1.442695, %v1505_v34 }
 0x3f0   : > { %v1726_v43 = vadd.f32 %v3212_v46, %v1725_v38  ;;  %v1561_v38 = vmul.f32 1.442695, %v1489_v51  ;;  %v3252_v12 = vpop.eup %2565  ;;  %2577 = vpow2.f32 %v1557_v48  ;;  %v1573_v51 = vmul.f32 1.442695, %v1495_v32 }
 0x3f1   : > { %v3257_v46 = vpop.eup %2567  ;;  %2579 = vpow2.f32 %v1663_v55  ;;  %v1673_v8 = vadd.f32 %v3252_v12, %v3248_v4  ;;  %v1501_v32 = vsub.f32 %v2910_v1, %v3178_v21  ;;  %v1597_v61 = vmul.f32 1.442695, %v1507_v11 }
 0x3f2   : > { %v1727_v50 = vadd.f32 %v3216_v57, %v1726_v43  ;;  %v1569_v43 = vmul.f32 1.442695, %v1493_v20  ;;  %v3261_v18 = vpop.eup %2569  ;;  %2581 = vpow2.f32 %v1561_v38  ;;  %v1605_v20 = vmul.f32 1.442695, %v1511_v27 }
 0x3f3   : > { %2583 = vpow2.f32 %v1565_v49  ;;  %v1503_v38 = vsub.f32 %v2914_v3, %v3178_v21  ;;  %v1577_v9 = vmul.f32 1.442695, %v1497_v24  ;;  %v1581_v34 = vmul.f32 1.442695, %v1499_v6 }
 0x3f4   : > { %v1728_v44 = vadd.f32 %v3221_v13, %v1727_v50  ;;  %v3266_v50 = vpop.eup %2571  ;;  %2585 = vpow2.f32 %v1569_v43  ;;  %v1544_v24 = vsub.f32 %v3062_v36, %v3077_v40 }
 0x3f5   : > { %v3272_v48 = vpop.eup %2573  ;;  %2587 = vpow2.f32 %v1573_v51 }
 0x3f6   : > { %v1729_v14 = vadd.f32 %v3225_v47, %v1728_v44  ;;  %v3277_v63 = vpop.eup %2575  ;;  %v1674_v27 = vadd.f32 %v3272_v48, %v1673_v8  ;;  %v1542_v44 = vsub.f32 %v3041_v7, %v3077_v40  ;;  %2589 = vpow2.f32 %v1601_v29 }
 0x3f7   : > { %v3282_v49 = vpop.eup %2577  ;;  %2591 = vpow2.f32 %v1605_v20  ;;  %v1585_v8 = vmul.f32 1.442695, %v1501_v32  ;;  %v1589_v29 = vmul.f32 1.442695, %v1503_v38  ;;  %v1671_v40 = vmul.f32 1.442695, %v1544_v24 }
 0x3f8   : > { %v1730_v55 = vadd.f32 %v3230_v15, %v1729_v14  ;;  %v3287_v1 = vpop.eup %2579  ;;  %v1675_v43 = vadd.f32 %v3282_v49, %v1674_v27  ;;  %2593 = vpow2.f32 %v1593_v59  ;;  %v1667_v3 = vmul.f32 1.442695, %v1542_v44 }
 0x3f9   : > { %v3292_v11 = vpop.eup %2581  ;;  %2595 = vpow2.f32 %v1597_v61  ;;  %v1541_v44 = vsub.f32 %v3081_v56, %v3178_v21  ;;  %v1539_v56 = vsub.f32 %v3071_v5, %v3178_v21  ;;  %v1533_v5 = vsub.f32 %v3025_v0, %v3178_v21 }
 0x3fa   : > { %v1731_v14 = vadd.f32 %v3234_v53, %v1730_v55  ;;  %v3295_v7 = vpop.eup %2583  ;;  %v1676_v6 = vadd.f32 %v3292_v11, %v1675_v43  ;;  %2597 = vpow2.f32 %v1577_v9  ;;  %v1519_v0 = vsub.f32 %v2959_v25, %v3178_v21 }
 0x3fb   : > { %v3300_v20 = vpop.eup %2585  ;;  %2599 = vpow2.f32 %v1581_v34  ;;  %v1521_v25 = vsub.f32 %v2967_v31, %v3178_v21  ;;  %v1527_v31 = vsub.f32 %v2987_v41, %v3178_v21 }
 0x3fc   : > { %v1732_v51 = vadd.f32 %v3239_v35, %v1731_v14  ;;  %v3303_v27 = vpop.eup %2587  ;;  %v1677_v32 = vadd.f32 %v3295_v7, %v1676_v6  ;;  %2601 = vpow2.f32 %v1585_v8  ;;  %v1537_v6 = vsub.f32 %v3059_v42, %v3178_v21 }
 0x3fd   : > { %v3306_v59 = vpop.eup %2589  ;;  %2603 = vpow2.f32 %v1589_v29 }
 0x3fe   : > { %v1733_v55 = vadd.f32 %v3243_v26, %v1732_v51  ;;  %v3309_v36 = vpop.eup %2591  ;;  %v1678_v38 = vadd.f32 %v3300_v20, %v1677_v32  ;;  %2605 = vpow2.f32 %v1667_v3  ;;  %v1543_v51 = vsub.f32 %v3105_v52, %v3178_v21 }
 0x3ff   : > { %v2594_v61 = vpop.eup %2593  ;;  %v1762_v34 = vpack.c.bf16 %v3309_v36, %v3306_v59  ;;  %2607 = vpow2.f32 %v1671_v40  ;;  %v1513_v52 = vsub.f32 %v2941_v16, %v3178_v21  ;;  %v1517_v16 = vsub.f32 %v2953_v22, %v3178_v21 }
 0x400   : > { %v1734_v14 = vadd.f32 %v3257_v46, %v1733_v55  ;;  %v2596_v43 = vpop.eup %2595  ;;  %v1679_v8 = vadd.f32 %v3303_v27, %v1678_v38  ;;  %v1665_v38 = vmul.f32 1.442695, %v1541_v44  ;;  %v1669_v42 = vmul.f32 1.442695, %v1543_v51 }
 0x401   : > { %v2598_v24 = vpop.eup %2597  ;;  %1786 = vmatpush.bf16.msra.mxu0 %v1762_v34  ;;  %v1760_v13 = vpack.c.bf16 %v2596_v43, %v2594_v61  ;;  %v1535_v44 = vsub.f32 %v3037_v2, %v3178_v21  ;;  %v1609_v51 = vmul.f32 1.442695, %v1513_v52  ;;  %v1529_v2 = vsub.f32 %v2995_v45, %v3178_v21 }
 0x402   : > { %v1735_v9 = vadd.f32 %v3261_v18, %v1734_v14  ;;  %v2600_v55 = vpop.eup %2599  ;;  %v1680_v32 = vadd.f32 %v2598_v24, %v1679_v8  ;;  %v1657_v8 = vmul.f32 1.442695, %v1537_v6  ;;  %2609 = vpow2.f32 %v1665_v38 }
 0x403   : > { %v2602_v14 = vpop.eup %2601  ;;  %2611 = vpow2.f32 %v1669_v42  ;;  %v1653_v52 = vmul.f32 1.442695, %v1535_v44  ;;  %v1621_v45 = vmul.f32 1.442695, %v1519_v0 }
 0x404   : > { %v1736_v29 = vadd.f32 %v3266_v50, %v1735_v9  ;;  %v2604_v57 = vpop.eup %2603  ;;  %v1515_v9 = vsub.f32 %v2947_v19, %v3178_v21  ;;  %v1681_v34 = vadd.f32 %v2600_v55, %v1680_v32  ;;  %2613 = vpow2.f32 %v1657_v8 }
 0x405   : > { %1787 = vmatpush.bf16.msra.mxu0 %v1760_v13  ;;  %v3333_v15 = vpop.eup %2605  ;;  %v1758_v32 = vpack.c.bf16 %v2604_v57, %v2602_v14 }
 0x406   : > { %v1737_v3 = vadd.f32 %v3277_v63, %v1736_v29  ;;  %v1661_v29 = vmul.f32 1.442695, %v1539_v56  ;;  %v1682_v47 = vadd.f32 %v2602_v14, %v1681_v34  ;;  %v1613_v13 = vmul.f32 1.442695, %v1515_v9 }
 0x407   : > { %v1649_v56 = vmul.f32 1.442695, %v1533_v5  ;;  %v1531_v14 = vsub.f32 %v3015_v58, %v3178_v21  ;;  %v1523_v9 = vsub.f32 %v2971_v33, %v3178_v21  ;;  %v1525_v58 = vsub.f32 %v2979_v37, %v3178_v21 }
 0x408   : > { %v1738_v40 = vadd.f32 %v3287_v1, %v1737_v3  ;;  %v3340_v3 = vpop.eup %2607  ;;  %v1683_v6 = vadd.f32 %v2604_v57, %v1682_v47  ;;  %2615 = vpow2.f32 %v1661_v29  ;;  %v1617_v57 = vmul.f32 1.442695, %v1517_v16 }
 0x409   : > { %1788 = vmatpush.bf16.msra.mxu0 %v1758_v32  ;;  %2617 = vpow2.f32 %v1609_v51  ;;  %v1756_v47 = vpack.c.bf16 %v2600_v55, %v2598_v24  ;;  %v3355_v34 = vpop.eup %2609  ;;  %v1645_v24 = vmul.f32 1.442695, %v1531_v14  ;;  %v1754_v37 = vpack.c.bf16 %v3303_v27, %v3300_v20 }
 0x40a   : > { %v1739_v19 = vadd.f32 %v3333_v15, %v1738_v40  ;;  %v1684_v38 = vadd.f32 %v2594_v61, %v1683_v6  ;;  %2619 = vpow2.f32 %v1613_v13  ;;  %v1641_v40 = vmul.f32 1.442695, %v1529_v2  ;;  %v3359_v61 = vpop.eup %2611 }
 0x40b   : > { %2621 = vpow2.f32 %v1649_v56  ;;  %v3364_v55 = vpop.eup %2613  ;;  %v1778_v5 = vpack.c.bf16 %v3359_v61, %v3355_v34  ;;  %v1629_v16 = vmul.f32 1.442695, %v1523_v9  ;;  %v1633_v44 = vmul.f32 1.442695, %v1525_v58 }
 0x40c   : > { %v3345_v22 = vadd.f32 %v3340_v3, %v1739_v19  ;;  %v1685_v42 = vadd.f32 %v2596_v43, %v1684_v38  ;;  %2623 = vpow2.f32 %v1653_v52  ;;  %v1625_v43 = vmul.f32 1.442695, %v1521_v25 }
 0x40d   : > { %1789 = vmatpush.bf16.msra.mxu0 %v1756_v47  ;;  %2625 = vpow2.f32 %v1617_v57  ;;  %1799 = vmatpush.bf16.msra.mxu1 %v1778_v5  ;;  %v1637_v29 = vmul.f32 1.442695, %v1527_v31  ;;  %v1752_v27 = vpack.c.bf16 %v3295_v7, %v3292_v11  ;;  %v1750_v14 = vpack.c.bf16 %v3282_v49, %v3272_v48  ;;  %v3597_v31 = vld [vmem:[#allocation6_spill] sm:$0xff] }
 0x40e   : > { %v1686_v33 = vadd.f32 %v3306_v59, %v1685_v42  ;;  %v3370_v8 = vpop.eup %2615  ;;  %2627 = vpow2.f32 %v1621_v45  ;;  %v1748_v9 = vpack.c.bf16 %v3252_v12, %v3248_v4  ;;  %v1763_v58 = vpack.c.bf16 %v3203_v30, %v3198_v62 }
 0x40f   : > { %v3373_v21 = vpop.eup %2617  ;;  %2629 = vpow2.f32 %v1641_v40  ;;  %v1776_v20 = vpack.c.bf16 %v3370_v8, %v3364_v55 }
 0x410   : > { %v1687_v41 = vadd.f32 %v3309_v36, %v1686_v33  ;;  %v2620_v59 = vpop.eup %2619  ;;  %2631 = vpow2.f32 %v1645_v24  ;;  %v1761_v24 = vpack.c.bf16 %v3192_v54, %v3187_v10 }
 0x411   : > { %1790 = vmatpush.bf16.msra.mxu0 %v1754_v37  ;;  %v2622_v51 = vpop.eup %2621  ;;  %2633 = vpow2.f32 %v1625_v43  ;;  %1800 = vmatpush.bf16.msra.mxu1 %v1776_v20  ;;  %v1759_v43 = vpack.c.bf16 %v3180_v23, %v3171_v39  ;;  %v1757_v37 = vpack.c.bf16 %v3164_v60, %v3157_v28  ;;  %v1764_v10 = vpack.c.bf16 %v2620_v59, %v3373_v21  ;;  %v3598_v39 = vld [vmem:[#allocation9_spill] sm:$0xff]  ;;  %v3599_v60 = vld [vmem:[#allocation7_spill] sm:$0xff]  ;;  %v3608_v20 = vld [vmem:[#allocation18_spill] sm:$0xff] }
 0x412   : > { %v1688_v19 = vadd.f32 %v3373_v21, %v1687_v41  ;;  %v2624_v36 = vpop.eup %2623  ;;  %2635 = vpow2.f32 %v1629_v16  ;;  %v1779_v41 = vpack.c.bf16 %v3340_v3, %v3333_v15  ;;  %v1755_v23 = vpack.c.bf16 %v3598_v39, %v3143_v17  ;;  %v3600_v21 = vld [vmem:[#allocation26_spill] sm:$0xff]  ;;  %v3602_v15 = vld [vmem:[#allocation24_spill] sm:$0xff]  ;;  %v3603_v3 = vld [vmem:[#allocation25_spill] sm:$0xff] }
 0x413   : > { %v2626_v0 = vpop.eup %2625  ;;  %2637 = vpow2.f32 %v1633_v44  ;;  %v1774_v56 = vpack.c.bf16 %v2624_v36, %v2622_v51  ;;  %v1751_v17 = vpack.c.bf16 %v3603_v3, %v3602_v15 }
 0x414   : > { %v1689_v32 = vadd.f32 %v2620_v59, %v1688_v19  ;;  %v2628_v13 = vpop.eup %2627  ;;  %2639 = vpow2.f32 %v1637_v29  ;;  %v3605_v29 = vld [vmem:[#allocation22_spill] sm:$0xff]  ;;  %v3606_v19 = vld [vmem:[#allocation23_spill] sm:$0xff] }
 0x415   : > { %1791 = vmatpush.bf16.msra.mxu0 %v1752_v27  ;;  %v2630_v2 = vpop.eup %2629  ;;  %1801 = vmatpush.bf16.msra.mxu1 %v1774_v56  ;;  %v1766_v30 = vpack.c.bf16 %v2628_v13, %v2626_v0 }
 0x416   : > { %v1690_v6 = vadd.f32 %v2626_v0, %v1689_v32  ;;  %v2632_v52 = vpop.eup %2631 }
 0x417   : > { %v2634_v25 = vpop.eup %2633  ;;  %v1772_v47 = vpack.c.bf16 %v2632_v52, %v2630_v2 }
 0x418   : > { %v1691_v38 = vadd.f32 %v2628_v13, %v1690_v6  ;;  %v2636_v11 = vpop.eup %2635 }
 0x419   : > { %1792 = vmatpush.bf16.msra.mxu0 %v1750_v14  ;;  %v2638_v57 = vpop.eup %2637  ;;  %1802 = vmatpush.bf16.msra.mxu1 %v1772_v47  ;;  %v1768_v4 = vpack.c.bf16 %v2636_v11, %v2634_v25 }
 0x41a   : > { %v1692_v7 = vadd.f32 %v2634_v25, %v1691_v38  ;;  %v2640_v45 = vpop.eup %2639  ;;  %v1741_v38 = vrot.slane %v3345_v22, 4 }
 0x41b   : > { %v1770_v49 = vpack.c.bf16 %v2640_v45, %v2638_v57 }
 0x41c   : > { %v1693_v42 = vadd.f32 %v2636_v11, %v1692_v7  ;;  %v1895_v7 = vld.sshfl [vmem:[#allocation1] sm:$0xff pattern:$0x75316420] }
 0x41d   : > { %1793 = vmatpush.bf16.msra.mxu0 %v1748_v9  ;;  %1803 = vmatpush.bf16.msra.mxu1 %v1770_v49  ;;  %v3613_v9 = vld [vmem:[#allocation5_spill] sm:$0xff]  ;;  %v1842_v49 = vld [vmem:[%s3509_s8] sm:$0xf] }
 0x41e   : > { %v1694_v48 = vadd.f32 %v2638_v57, %v1693_v42  ;;  %v1896_v57 = vld.sshfl [vmem:[#allocation1 + $0x8] sm:$0xff pattern:$0x75316420]  ;;  %v1742_v42 = vadd.f32 %v1741_v38, %v3345_v22  ;;  %v1944_v22 = vld [vmem:[%s3511_s10] sm:$0xf] }
 0x41f   : > { %1998 = vst [vmem:[#allocation1] ss:$2 sm:$0xff] %v3613_v9  ;;  %1947 = vperm.xlu1 %2511, %v1944_v22  }
 0x420   : > { %v1695_v40 = vadd.f32 %v2640_v45, %v1694_v48  ;;  %1794 = vmatmul.bf16.vlgmr.msra.gmra.mxu0 %v3597_v31  ;;  %v1843_v45 = vld [vmem:[%s3510_s9] sm:$0xf]  ;;  %v1743_v48 = vrot.slane %v1742_v42, 2 }
 0x421   : > { %1812 = vmatpush.bf16.msrb.mxu0 %v1763_v58  ;;  %1804 = vmatpush.bf16.msra.mxu1 %v1768_v4  ;;  %v1953_v4 = vld [vmem:[%s3513_s12] sm:$0xf] }
 0x422   : > { %v1696_v33 = vadd.f32 %v2630_v2, %v1695_v40 }
 0x424   : > { %v1697_v12 = vadd.f32 %v2632_v52, %v1696_v33 }
 0x425   : > { %1813 = vmatpush.bf16.msrb.mxu0 %v1761_v24  ;;  %1805 = vmatpush.bf16.msra.mxu1 %v1766_v30  ;;  %v2048_v30 = vld [vmem:[%s3514_s13] sm:$0xf] }
 0x426   : > { %v1698_v62 = vadd.f32 %v2622_v51, %v1697_v12  ;;  %v1749_v51 = vpack.c.bf16 %v3606_v19, %v3605_v29  ;;  %v1999_v33 = vld.sshfl [vmem:[#allocation1] sm:$0xff pattern:$0x75316420]  ;;  %2051 = vperm.xlu2 %2512, %v2048_v30  }
 0x428   : > { %v1699_v5 = vadd.f32 %v2624_v36, %v1698_v62  ;;  %v1952_v62 = vld [vmem:[%s3512_s11] sm:$0xf] }
 0x429   : > { %1814 = vmatpush.bf16.msrb.mxu0 %v1759_v43  ;;  %1806 = vmatpush.bf16.msra.mxu1 %v1764_v10 }
 0x42a   : > { %v1700_v16 = vadd.f32 %v3364_v55, %v1699_v5  ;;  %v1777_v55 = vpack.c.bf16 %v3287_v1, %v3277_v63  ;;  %v1771_v63 = vpack.c.bf16 %v3239_v35, %v3234_v53  ;;  %v3607_v1 = vld [vmem:[#allocation13_spill] sm:$0xff] }
 0x42b   : > { %v1769_v27 = vpack.c.bf16 %v3608_v20, %v3607_v1 }
 0x42c   : > { %v1701_v54 = vadd.f32 %v3370_v8, %v1700_v16  ;;  %1807 = vmatmul.bf16.vlgmr.msra.gmra.mxu1 %v3599_v60  ;;  %v3601_v8 = vld [vmem:[#allocation8_spill] sm:$0xff] }
 0x42d   : > { %1815 = vmatpush.bf16.msrb.mxu0 %v1757_v37  ;;  %1825 = vmatpush.bf16.msrb.mxu1 %v1779_v41  ;;  %v1753_v59 = vpack.c.bf16 %v3601_v8, %v3600_v21  ;;  %v2000_v41 = vld.sshfl [vmem:[#allocation1 + $0x8] sm:$0xff pattern:$0x75316420] }
 0x42e   : > { %v1702_v44 = vadd.f32 %v3355_v34, %v1701_v54  ;;  %v3604_v34 = vpack.c.bf16 %v3266_v50, %v3261_v18  ;;  %v3609_v18 = vld [vmem:[#allocation12_spill] sm:$0xff]  ;;  %v3610_v50 = vld [vmem:[#allocation15_spill] sm:$0xff] }
 0x42f   : > { %v1767_v36 = vpack.c.bf16 %v3610_v50, %v3609_v18 }
 0x430   : > { %v1703_v28 = vadd.f32 %v3359_v61, %v1702_v44  ;;  %v1773_v61 = vpack.c.bf16 %v3257_v46, %v3243_v26  ;;  %v3611_v46 = vld [vmem:[#allocation10_spill] sm:$0xff]  ;;  %v3612_v26 = vld [vmem:[#allocation11_spill] sm:$0xff] }
 0x431   : > { %1816 = vmatpush.bf16.msrb.mxu0 %v1755_v23  ;;  %1826 = vmatpush.bf16.msrb.mxu1 %v1777_v55  ;;  %v1765_v32 = vpack.c.bf16 %v3612_v26, %v3611_v46 }
 0x432   : > { %v1704_v0 = vrot.slane %v1703_v28, 4 }
 0x434   : > { %v1705_v13 = vadd.f32 %v1704_v0, %v1703_v28 }
 0x435   : > { %1817 = vmatpush.bf16.msrb.mxu0 %v1753_v59  ;;  %1827 = vmatpush.bf16.msrb.mxu1 %v3604_v34 }
 0x436   : > { %v1706_v53 = vrot.slane %v1705_v13, 2 }
 0x438   : > { %v1707_v6 = vadd.f32 %v1706_v53, %v1705_v13 }
 0x439   : > { %1818 = vmatpush.bf16.msrb.mxu0 %v1751_v17  ;;  %1828 = vmatpush.bf16.msrb.mxu1 %v1773_v61 }
 0x43a   : > { %v1708_v2 = vrot.slane %v1707_v6, 1 }
 0x43c   : > { %v1709_v56 = vadd.f32 %v1708_v2, %v1707_v6 }
 0x43d   : > { %1819 = vmatpush.bf16.msrb.mxu0 %v1749_v51  ;;  %1829 = vmatpush.bf16.msrb.mxu1 %v1771_v63 }
 0x43e   : > { %2641 = vrcp.f32 %v1709_v56 }
 0x440   : > { %1820 = vmatmul.bf16.vlgmr.msrb.gmra.mxu0 %v3597_v31  ;;  %v1744_v31 = vadd.f32 %v1743_v48, %v1742_v42 }
 0x441   : > { %1830 = vmatpush.bf16.msrb.mxu1 %v1769_v27 }
 0x442   : > { %v1745_v24 = vrot.slane %v1744_v31, 1 }
 0x444   : > { %v2642_v11 = vpop.eup %2641  ;;  %v1746_v12 = vadd.f32 %v1745_v24, %v1744_v31 }
 0x445   : > { %1831 = vmatpush.bf16.msrb.mxu1 %v1767_v36 }
 0x446   : > { %2643 = vrcp.f32 %v1746_v12 }
 0x449   : > { %1832 = vmatpush.bf16.msrb.mxu1 %v1765_v32 }
 0x44c   : > { %1833 = vmatmul.bf16.vlgmr.msrb.gmra.mxu1 %v3599_v60  ;;  %v2644_v16 = vpop.eup %2643 }
 0x480   : > { %v2052_v36 = vpop.permute.xlu2 %2051 }
 0x491   : > { %v1948_v60 = vpop.permute.xlu1 %1947 }
 0x49d   : > { %v1795_v35 = vpop.f32.mrf.mxu0 }
 0x4a5   : > { %v1797_v14 = vpop.f32.mrf.mxu0 }
 0x4a9   : > { %v1808_v52 = vpop.f32.mrf.mxu1 }
 0x4aa   : > { %v1809_v25 = vadd.f32 %v1808_v52, %v1795_v35 }
 0x4ac   : > { %v1840_v47 = vmul.f32 %v2642_v11, %v1809_v25  ;;  %v2670_v11 = vmov 0.0  }
 0x4ad   : > { %642 = vst.msk [vmem:[%s631_s29] sm:$0xf] %vm641_vm4, %v2670_v11 }
 0x4ae   : > { %2444 = vmatpush.msk.msra.mxu0 %vm656_vm0, %v1840_v47  ;;  %643 = vst.msk [vmem:[%s635_s18] sm:$0xf] %vm641_vm4, %v2670_v11 }
 0x4af   : > { %2445 = vmatmul.msk.f32.vlgmr.msra.gmra.mxu0 %vm652_vm1, %v1843_v45 }
 0x4b0   : > { %2448 = vmatpush.msk.msrb.mxu0 %vm656_vm0, %v1895_v7 }
 0x4b1   : > { %v1810_v58 = vpop.f32.mrf.mxu1 }
 0x4b2   : > { %2452 = vmatpush.msk.msra.mxu0 %vm656_vm0, %v1840_v47 }
 0x4b5   : > { %v2086_v58 = vld [vmem:[%s635_s18] sm:$0xf] }
 0x4b7   : > { %2449 = vmatmul.msk.f32.vlgmr.msrb.gmra.mxu0 %vm652_vm1, %v1842_v49 }
 0x4b8   : > { %2456 = vmatpush.msk.msrb.mxu0 %vm656_vm0, %v1999_v33 }
 0x4bd   : > { %v1821_v40 = vpop.f32.mrf.mxu0 }
 0x4bf   : > { %2453 = vmatmul.msk.f32.vlgmr.msra.gmra.mxu0 %vm652_vm1, %v1953_v4 }
 0x4c5   : > { %v1823_v43 = vpop.f32.mrf.mxu0 }
 0x4c7   : > { %2457 = vmatmul.msk.f32.vlgmr.msrb.gmra.mxu0 %vm652_vm1, %v1952_v62 }
 0x4c9   : > { %v1834_v5 = vpop.f32.mrf.mxu1 }
 0x4ca   : > { %v1835_v37 = vadd.f32 %v1834_v5, %v1821_v40 }
 0x4cc   : > { %v1841_v10 = vmul.f32 %v2644_v16, %v1835_v37 }
 0x4ce   : > { %2446 = vmatpush.msk.msra.mxu1 %vm656_vm0, %v1841_v10 }
 0x4cf   : > { %2447 = vmatmul.msk.f32.vlgmr.msra.gmra.mxu1 %vm652_vm1, %v1843_v45 }
 0x4d0   : > { %2450 = vmatpush.msk.msrb.mxu1 %vm656_vm0, %v1896_v57  ;;  %v2068_v57 = vld [vmem:[%s631_s29] sm:$0xf] }
 0x4d1   : > { %v1836_v54 = vpop.f32.mrf.mxu1 }
 0x4d2   : > { %2454 = vmatpush.msk.msra.mxu1 %vm656_vm0, %v1841_v10 }
 0x4d7   : > { %2451 = vmatmul.msk.f32.vlgmr.msrb.gmra.mxu1 %vm652_vm1, %v1842_v49 }
 0x4d8   : > { %2458 = vmatpush.msk.msrb.mxu1 %vm656_vm0, %v2000_v41 }
 0x4df   : > { %2455 = vmatmul.msk.f32.vlgmr.msra.gmra.mxu1 %vm652_vm1, %v1953_v4 }
 0x4e7   : > { %2459 = vmatmul.msk.f32.vlgmr.msrb.gmra.mxu1 %vm652_vm1, %v1952_v62 }
 0x52c   : > { %v1870_v39 = vpop.f32.mrf.mxu0 }
 0x534   : > { %v1921_v23 = vpop.f32.mrf.mxu0 }
 0x535   : > { %v1922_v28 = vadd.f32 %v1921_v23, %v1870_v39 }
 0x537   : > { %v1950_v59 = vadd.f32 %v1948_v60, %v1922_v28 }
 0x539   : > { %v2069_v17 = vsel %vm656_vm0, %v1950_v59, 0.0  ;;  %v2074_v63 = vmul.f32 %v1950_v59, %v1950_v59 }
 0x53b   : > { %v2076_v18 = vsel %vm656_vm0, %v2074_v63, 0.0 }
 0x53c   : > { %v1974_v21 = vpop.f32.mrf.mxu0 }
 0x544   : > { %v2025_v1 = vpop.f32.mrf.mxu0 }
 0x545   : > { %v2026_v27 = vadd.f32 %v2025_v1, %v1974_v21 }
 0x547   : > { %v2054_v32 = vadd.f32 %v2052_v36, %v2026_v27 }
 0x549   : > { %v2087_v53 = vsel %vm656_vm0, %v2054_v32, 0.0  ;;  %v2092_v14 = vmul.f32 %v2054_v32, %v2054_v32 }
 0x54b   : > { %v2094_v38 = vsel %vm656_vm0, %v2092_v14, 0.0 }
 0x54c   : > { %v1890_v44 = vpop.f32.mrf.mxu1 }
 0x554   : > { %v1941_v55 = vpop.f32.mrf.mxu1 }
 0x555   : > { %v1942_v8 = vadd.f32 %v1941_v55, %v1890_v44 }
 0x557   : > { %v1951_v15 = vadd.f32 %v1948_v60, %v1942_v8 }
 0x559   : > { %v2058_v3 = vrot.slane %v1951_v15, 4  ;;  %v2070_v34 = vsel %vm656_vm0, %v1951_v15, 0.0  ;;  %v2075_v19 = vmul.f32 %v1951_v15, %v1951_v15 }
 0x55a   : > { %v2071_v61 = vadd.f32 %v2070_v34, %v2069_v17 }
 0x55b   : > { %v2059_v29 = vsel %vm656_vm0, %v1950_v59, %v2058_v3  ;;  %v2077_v20 = vsel %vm656_vm0, %v2075_v19, 0.0 }
 0x55c   : > { %2061 = vst [vmem:[%s616_s19] sm:$0xff] %v2059_v29  ;;  %v1994_v51 = vpop.f32.mrf.mxu1  ;;  %2072 = vadd.xlane.f32.xlu2 %v2071_v61  ;;  %v2078_v50 = vadd.f32 %v2077_v20, %v2076_v18 }
 0x564   : > { %v2045_v46 = vpop.f32.mrf.mxu1  ;;  %2079 = vadd.xlane.f32.xlu2 %v2078_v50 }
 0x565   : > { %v2046_v26 = vadd.f32 %v2045_v46, %v1994_v51 }
 0x567   : > { %v2055_v0 = vadd.f32 %v2052_v36, %v2046_v26 }
 0x569   : > { %v2064_v13 = vrot.slane %v2055_v0, 4  ;;  %v2088_v35 = vsel %vm656_vm0, %v2055_v0, 0.0  ;;  %v2093_v56 = vmul.f32 %v2055_v0, %v2055_v0 }
 0x56a   : > { %v2089_v6 = vadd.f32 %v2088_v35, %v2087_v53 }
 0x56b   : > { %v2065_v2 = vsel %vm656_vm0, %v2054_v32, %v2064_v13  ;;  %v2095_v52 = vsel %vm656_vm0, %v2093_v56, 0.0 }
 0x56c   : > { %2067 = vst [vmem:[%s626_s21] sm:$0xff] %v2065_v2  ;;  %2090 = vadd.xlane.f32.xlu2 %v2089_v6  ;;  %v2096_v25 = vadd.f32 %v2095_v52, %v2094_v38 }
 0x574   : > { %2097 = vadd.xlane.f32.xlu2 %v2096_v25 }
 0x5cf   : > { %v2073_v7 = vpop.xlane.xlu2 %2072 }
 0x5d7   : > { %v2080_v47 = vpop.xlane.xlu2 %2079 }
 0x5d8   : > { %v2082_v9 = vsel %vm2081_vm5, %v2073_v7, %v2080_v47 }
 0x5d9   : > { %v2083_v45 = vadd.f32 %v2082_v9, %v2068_v57 }
 0x5db   : > { %2085 = vst.msk [vmem:[%s631_s29] sm:$0xf] %vm641_vm4, %v2083_v45 }
 0x5df   : > { %v2091_v42 = vpop.xlane.xlu2 %2090 }
 0x5e7   : > { %v2098_v48 = vpop.xlane.xlu2 %2097 }
 0x5e8   : > { %v2099_v49 = vsel %vm2081_vm5, %v2091_v42, %v2098_v48 }
 0x5e9   : > { %v2100_v40 = vadd.f32 %v2099_v49, %v2086_v58 }
 0x5eb   : > { %2101 = vst.msk [vmem:[%s635_s18] sm:$0xf] %vm641_vm4, %v2100_v40 }
 0x5ec PF: > { %s28_s26 = sadd.s32 1, %s2667_s26   ;;  %s3614_s24 = smov %s2663_s25 }
 0x5ed   : > { %p25_p5 = scmp.ge.s32.totalorder %s28_s26, 4   ;;  %s3615_s25 = smov %s3617_s27 }
 0x5ef   :  { %27 = sbr.rel (!%p25_p5) target bundleno = 3 (0x3), region = 152 }

</bundles_post_ra>
